<compile_context>
chip_gen: v7x
topology: tpu7x:2x2x1
jax: 0.10.0
libtpu: 0.0.40
codegen_flags: <defaults>
</compile_context>

<pallas_src>
import functools
import math

import jax
import jax.numpy as jnp
from jax.experimental import pallas as pl
from jax.experimental.pallas import tpu as pltpu


def encoder_layer_kernel(x_ref, mask_ref,
                         ln1a_ref, ln1b_ref,
                         wqkv_ref, bqkv_ref,
                         wo_ref, bo_ref,
                         ln2a_ref, ln2b_ref,
                         w1_ref, b1_ref, w2_ref, b2_ref,
                         o_ref,
                         *, num_heads: int, eps: float):
    Bb, S, D = x_ref.shape
    M = Bb * S
    dh = D // num_heads
    scale = 1.0 / math.sqrt(dh)
    mxu_dtype = wqkv_ref.dtype          # bf16 weights; accumulate in f32
    inv_nm1 = 1.0 / (D - 1)

    # Fold (batch_block, seq) into the matmul M dimension.
    x = x_ref[...].reshape(M, D).astype(jnp.float32)

    def layer_norm(v, a, b):
        mean = jnp.mean(v, axis=-1, keepdims=True)
        diff = v - mean
        # torch.Tensor.std() is unbiased (divides by D-1); eps is added to std.
        var = jnp.sum(diff * diff, axis=-1, keepdims=True) * inv_nm1
        inv_std = pl.reciprocal(jnp.sqrt(var) + eps, approx=True)   # EUP slot
        return a * diff * inv_std + b

    # ---- sublayer 0: pre-LN multi-head self-attention + residual ----
    y = layer_norm(x, ln1a_ref[0], ln1b_ref[0])
    # Fused QKV projection: one MXU pass with N = 3D.
    qkv = jnp.dot(y.astype(mxu_dtype), wqkv_ref[...],
                  preferred_element_type=jnp.float32) + bqkv_ref[0]   # (M, 3D) f32
    qkv3 = qkv.reshape(Bb, S, 3 * D)

    # Mask bias computed ONCE (hoisted out of the head loop); broadcast over
    # heads and query rows like masked_fill(mask == 0, -1e9).
    mask_bias = jnp.where(mask_ref[...] == 0.0,
                          jnp.float32(-1e9), jnp.float32(0.0))        # (Bb, 1, S)

    wo = wo_ref[...]
    attn = jnp.zeros((M, D), jnp.float32)
    for h in range(num_heads):          # static unroll over heads
        lo = h * dh
        qh = qkv3[:, :, lo:lo + dh]                 # (Bb, S, dh)
        kh = qkv3[:, :, D + lo:D + lo + dh]
        vh = qkv3[:, :, 2 * D + lo:2 * D + lo + dh]
        s = jnp.einsum('bqd,bkd->bqk', qh, kh,
                       preferred_element_type=jnp.float32) * scale    # (Bb, S, S)
        s = s + mask_bias
        s = s - jnp.max(s, axis=-1, keepdims=True)
        p = jnp.exp(s)
        p = p * pl.reciprocal(jnp.sum(p, axis=-1, keepdims=True), approx=True)
        oh = jnp.einsum('bqk,bkd->bqd', p, vh,
                        preferred_element_type=jnp.float32)           # (Bb, S, dh)
        # Accumulate through the sublane slice of wo — no lane-axis concat of heads.
        attn = attn + jnp.dot(oh.reshape(M, dh).astype(mxu_dtype),
                              wo[lo:lo + dh, :],
                              preferred_element_type=jnp.float32)
    attn = attn + bo_ref[0]
    x1 = x + attn       # dropout == identity

    # ---- sublayer 1: pre-LN position-wise feed-forward + residual ----
    y2 = layer_norm(x1, ln2a_ref[0], ln2b_ref[0])
    h1 = jnp.dot(y2.astype(mxu_dtype), w1_ref[...],
                 preferred_element_type=jnp.float32) + b1_ref[0]
    h1 = jnp.maximum(h1, 0.0)
    ffn = jnp.dot(h1.astype(mxu_dtype), w2_ref[...],
                  preferred_element_type=jnp.float32) + b2_ref[0]

    o_ref[...] = (x1 + ffn).reshape(Bb, S, D)


def _pick_batch_block(B, S, target_rows=512):
    """Largest divisor of B such that block_b * S stays within target_rows."""
    bb = 1
    for cand in range(1, B + 1):
        if B % cand == 0 and cand * S <= target_rows:
            bb = cand
    return bb


def encoder_layer(x, mask, params, *, num_heads=4, eps=1e-6,
                  mxu_dtype=jnp.bfloat16):
    B, S, D = x.shape
    Dff = params["w1"].shape[1]
    bb = _pick_batch_block(B, S)
    grid = (B // bb,)

    # Host-side packing (layout plumbing, not compute hoisting):
    #   fuse Q/K/V weights into one (D, 3D) projection, cast big matmul weights
    #   to bf16; keep biases and LN params in f32 (added post-MXU in f32).
    wqkv = jnp.concatenate([params["wq"], params["wk"], params["wv"]],
                           axis=1).astype(mxu_dtype)
    bqkv = jnp.concatenate([params["bq"], params["bk"], params["bv"]],
                           axis=1).astype(jnp.float32)
    wo = params["wo"].astype(mxu_dtype)
    w1 = params["w1"].astype(mxu_dtype)
    w2 = params["w2"].astype(mxu_dtype)

    full = lambda shape: pl.BlockSpec(shape, lambda b: (0,) * len(shape))
    in_specs = [
        pl.BlockSpec((bb, S, D), lambda b: (b, 0, 0)),   # x (batch-blocked)
        pl.BlockSpec((bb, 1, S), lambda b: (b, 0, 0)),   # mask
        full((1, D)), full((1, D)),                      # ln1 a/b
        full((D, 3 * D)), full((1, 3 * D)),              # wqkv, bqkv (fused)
        full((D, D)), full((1, D)),                      # wo, bo
        full((1, D)), full((1, D)),                      # ln2 a/b
        full((D, Dff)), full((1, Dff)),                  # w1, b1
        full((Dff, D)), full((1, D)),                    # w2, b2
    ]

    kernel = functools.partial(encoder_layer_kernel, num_heads=num_heads, eps=eps)
    return pl.pallas_call(
        kernel,
        out_shape=jax.ShapeDtypeStruct((B, S, D), jnp.float32),
        grid_spec=pltpu.PrefetchScalarGridSpec(
            num_scalar_prefetch=0,
            grid=grid,
            in_specs=in_specs,
            out_specs=pl.BlockSpec((bb, S, D), lambda b: (b, 0, 0)),
        ),
        input_output_aliases={0: 0},     # reuse x's HBM buffer for the output
        compiler_params=pltpu.CompilerParams(
            dimension_semantics=("parallel",),
            vmem_limit_bytes=32 * 1024 * 1024,
        ),
    )(x, mask,
      params["ln1_a"], params["ln1_b"],
      wqkv, bqkv,
      wo, params["bo"],
      params["ln2_a"], params["ln2_b"],
      w1, params["b1"], w2, params["b2"])


def encoder_layer_ref(x, mask, params, *, num_heads=4, eps=1e-6):
    """Pure-JAX f32 reference mirroring the PyTorch forward."""
    B, S, D = x.shape
    dh = D // num_heads

    def layer_norm(v, a, b):
        mean = jnp.mean(v, axis=-1, keepdims=True)
        var = jnp.sum((v - mean) ** 2, axis=-1, keepdims=True) / (D - 1)
        std = jnp.sqrt(var)
        return a * (v - mean) / (std + eps) + b

    y = layer_norm(x, params["ln1_a"][0], params["ln1_b"][0])
    q = y @ params["wq"] + params["bq"][0]
    k = y @ params["wk"] + params["bk"][0]
    v = y @ params["wv"] + params["bv"][0]
    q = q.reshape(B, S, num_heads, dh).transpose(0, 2, 1, 3)
    k = k.reshape(B, S, num_heads, dh).transpose(0, 2, 1, 3)
    v = v.reshape(B, S, num_heads, dh).transpose(0, 2, 1, 3)
    s = jnp.einsum("bhqd,bhkd->bhqk", q, k) / math.sqrt(dh)
    s = jnp.where(mask[:, None, :, :] == 0, -1e9, s)
    p = jax.nn.softmax(s, axis=-1)
    a = jnp.einsum("bhqk,bhkd->bhqd", p, v).transpose(0, 2, 1, 3).reshape(B, S, D)
    a = a @ params["wo"] + params["bo"][0]
    x1 = x + a
    y2 = layer_norm(x1, params["ln2_a"][0], params["ln2_b"][0])
    h1 = jnp.maximum(y2 @ params["w1"] + params["b1"][0], 0.0)
    return x1 + h1 @ params["w2"] + params["b2"][0]


if __name__ == "__main__":
    B, S, D, H, Dff = 2, 8, 32, 4, 64
    key = jax.random.PRNGKey(0)
    ks = jax.random.split(key, 12)

    x = jax.random.normal(ks[0], (B, S, D), dtype=jnp.float32)
    # mask: last 2 positions of batch element 1 are masked out
    mask = jnp.ones((B, 1, S), dtype=jnp.float32)
    mask = mask.at[1, 0, S - 2:].set(0.0)

    sc = 0.1
    params = {
        "ln1_a": jnp.ones((1, D), jnp.float32),
        "ln1_b": jnp.zeros((1, D), jnp.float32),
        "ln2_a": jnp.ones((1, D), jnp.float32),
        "ln2_b": jnp.zeros((1, D), jnp.float32),
        "wq": sc * jax.random.normal(ks[1], (D, D), jnp.float32),
        "bq": sc * jax.random.normal(ks[2], (1, D), jnp.float32),
        "wk": sc * jax.random.normal(ks[3], (D, D), jnp.float32),
        "bk": sc * jax.random.normal(ks[4], (1, D), jnp.float32),
        "wv": sc * jax.random.normal(ks[5], (D, D), jnp.float32),
        "bv": sc * jax.random.normal(ks[6], (1, D), jnp.float32),
        "wo": sc * jax.random.normal(ks[7], (D, D), jnp.float32),
        "bo": sc * jax.random.normal(ks[8], (1, D), jnp.float32),
        "w1": sc * jax.random.normal(ks[9], (D, Dff), jnp.float32),
        "b1": sc * jax.random.normal(ks[10], (1, Dff), jnp.float32),
        "w2": sc * jax.random.normal(ks[11], (Dff, D), jnp.float32),
        "b2": jnp.zeros((1, D), jnp.float32),
    }

    # Reference first (kernel aliases/overwrites x's buffer at the XLA level).
    ref = encoder_layer_ref(x, mask, params, num_heads=H)
    ref = jax.block_until_ready(ref)

    out = encoder_layer(x, mask, params, num_heads=H)
    out = jax.block_until_ready(out)

    assert out.shape == (B, S, D)
    # bf16 MXU inputs + EUP approx reciprocals => tolerance loosened vs pure f32.
    assert jnp.allclose(out, ref, atol=2e-2, rtol=2e-2), "mismatch vs JAX reference"

    # TODO(synk): dropout is treated as identity (deterministic eval-mode forward).
    print("KERNEL_OK")
</pallas_src>

<mosaic_0001>
module attributes {stable_mosaic.version = 11 : i64} {
  func.func @encoder_layer_kernel(%arg0: i32, %arg1: memref<2x8x32xf32, #tpu.memory_space<vmem>>, %arg2: memref<2x1x8xf32, #tpu.memory_space<vmem>>, %arg3: memref<1x32xf32, #tpu.memory_space<vmem>>, %arg4: memref<1x32xf32, #tpu.memory_space<vmem>>, %arg5: memref<32x96xbf16, #tpu.memory_space<vmem>>, %arg6: memref<1x96xf32, #tpu.memory_space<vmem>>, %arg7: memref<32x32xbf16, #tpu.memory_space<vmem>>, %arg8: memref<1x32xf32, #tpu.memory_space<vmem>>, %arg9: memref<1x32xf32, #tpu.memory_space<vmem>>, %arg10: memref<1x32xf32, #tpu.memory_space<vmem>>, %arg11: memref<32x64xbf16, #tpu.memory_space<vmem>>, %arg12: memref<1x64xf32, #tpu.memory_space<vmem>>, %arg13: memref<64x32xbf16, #tpu.memory_space<vmem>>, %arg14: memref<1x32xf32, #tpu.memory_space<vmem>>, %arg15: memref<2x8x32xf32, #tpu.memory_space<vmem>>) attributes {dimension_semantics = [#tpu.dimension_semantics<parallel>], iteration_bounds = array<i64: 1>, scalar_prefetch = 0 : i64, scratch_operands = 0 : i64, tpu.core_type = #tpu.core_type<tc>, window_params = [{transform_indices = @transform_0, window_bounds = array<i64: 2, 8, 32>}, {transform_indices = @transform_1, window_bounds = array<i64: 2, 1, 8>}, {pipeline_mode = #tpu.pipeline_mode<synchronous>, transform_indices = @transform_2, window_bounds = array<i64: 1, 32>}, {pipeline_mode = #tpu.pipeline_mode<synchronous>, transform_indices = @transform_3, window_bounds = array<i64: 1, 32>}, {pipeline_mode = #tpu.pipeline_mode<synchronous>, transform_indices = @transform_4, window_bounds = array<i64: 32, 96>}, {pipeline_mode = #tpu.pipeline_mode<synchronous>, transform_indices = @transform_5, window_bounds = array<i64: 1, 96>}, {pipeline_mode = #tpu.pipeline_mode<synchronous>, transform_indices = @transform_6, window_bounds = array<i64: 32, 32>}, {pipeline_mode = #tpu.pipeline_mode<synchronous>, transform_indices = @transform_7, window_bounds = array<i64: 1, 32>}, {pipeline_mode = #tpu.pipeline_mode<synchronous>, transform_indices = @transform_8, window_bounds = array<i64: 1, 32>}, {pipeline_mode = #tpu.pipeline_mode<synchronous>, transform_indices = @transform_9, window_bounds = array<i64: 1, 32>}, {pipeline_mode = #tpu.pipeline_mode<synchronous>, transform_indices = @transform_10, window_bounds = array<i64: 32, 64>}, {pipeline_mode = #tpu.pipeline_mode<synchronous>, transform_indices = @transform_11, window_bounds = array<i64: 1, 64>}, {pipeline_mode = #tpu.pipeline_mode<synchronous>, transform_indices = @transform_12, window_bounds = array<i64: 64, 32>}, {pipeline_mode = #tpu.pipeline_mode<synchronous>, transform_indices = @transform_13, window_bounds = array<i64: 1, 32>}, {transform_indices = @transform_14, window_bounds = array<i64: 2, 8, 32>}]} {
    %c0 = arith.constant 0 : index
    %c0_0 = arith.constant 0 : index
    %c0_1 = arith.constant 0 : index
    %0 = vector.load %arg1[%c0, %c0_0, %c0_1] : memref<2x8x32xf32, #tpu.memory_space<vmem>>, vector<2x8x32xf32>
    %1 = vector.shape_cast %0 : vector<2x8x32xf32> to vector<16x32xf32>
    %c0_2 = arith.constant 0 : index
    %c0_3 = arith.constant 0 : index
    %2 = vector.load %arg3[%c0_2, %c0_3] : memref<1x32xf32, #tpu.memory_space<vmem>>, vector<1x32xf32>
    %3 = vector.shape_cast %2 : vector<1x32xf32> to vector<32xf32>
    %c0_4 = arith.constant 0 : index
    %c0_5 = arith.constant 0 : index
    %4 = vector.load %arg4[%c0_4, %c0_5] : memref<1x32xf32, #tpu.memory_space<vmem>>, vector<1x32xf32>
    %5 = vector.shape_cast %4 : vector<1x32xf32> to vector<32xf32>
    %cst = arith.constant dense<0.000000e+00> : vector<16xf32>
    %6 = vector.multi_reduction <add>, %1, %cst [1] : vector<16x32xf32> to vector<16xf32>
    %7 = vector.shape_cast %6 : vector<16xf32> to vector<16x1xf32>
    %cst_6 = arith.constant 3.200000e+01 : f32
    %8 = vector.broadcast %cst_6 : f32 to vector<16x1xf32>
    %9 = arith.divf %7, %8 : vector<16x1xf32>
    %10 = vector.broadcast %9 : vector<16x1xf32> to vector<16x32xf32>
    %11 = arith.subf %1, %10 : vector<16x32xf32>
    %12 = arith.mulf %11, %11 : vector<16x32xf32>
    %cst_7 = arith.constant dense<0.000000e+00> : vector<16xf32>
    %13 = vector.multi_reduction <add>, %12, %cst_7 [1] : vector<16x32xf32> to vector<16xf32>
    %14 = vector.shape_cast %13 : vector<16xf32> to vector<16x1xf32>
    %cst_8 = arith.constant 0.0322580636 : f32
    %15 = vector.broadcast %cst_8 : f32 to vector<16x1xf32>
    %16 = arith.mulf %14, %15 : vector<16x1xf32>
    %17 = math.sqrt %16 : vector<16x1xf32>
    %cst_9 = arith.constant 9.99999997E-7 : f32
    %18 = vector.broadcast %cst_9 : f32 to vector<16x1xf32>
    %19 = arith.addf %17, %18 : vector<16x1xf32>
    %20 = tpu.reciprocal %19 {approx = true} : vector<16x1xf32> -> vector<16x1xf32>
    %21 = vector.shape_cast %3 : vector<32xf32> to vector<1x32xf32>
    %22 = vector.broadcast %21 : vector<1x32xf32> to vector<16x32xf32>
    %23 = arith.mulf %22, %11 : vector<16x32xf32>
    %24 = vector.broadcast %20 : vector<16x1xf32> to vector<16x32xf32>
    %25 = arith.mulf %23, %24 : vector<16x32xf32>
    %26 = vector.shape_cast %5 : vector<32xf32> to vector<1x32xf32>
    %27 = vector.broadcast %26 : vector<1x32xf32> to vector<16x32xf32>
    %28 = arith.addf %25, %27 : vector<16x32xf32>
    %29 = arith.truncf %28 : vector<16x32xf32> to vector<16x32xbf16>
    %c0_10 = arith.constant 0 : index
    %c0_11 = arith.constant 0 : index
    %30 = vector.load %arg5[%c0_10, %c0_11] : memref<32x96xbf16, #tpu.memory_space<vmem>>, vector<32x96xbf16>
    %cst_12 = arith.constant dense<0.000000e+00> : vector<16x96xf32>
    %31 = tpu.matmul %29, %30, %cst_12 {dimension_numbers = #tpu.dot_dimension_numbers<[1], [0], [0], [1], [0, 0, 1, 1], [], []>} : vector<16x32xbf16>, vector<32x96xbf16>, vector<16x96xf32> -> vector<16x96xf32>
    %c0_13 = arith.constant 0 : index
    %c0_14 = arith.constant 0 : index
    %32 = vector.load %arg6[%c0_13, %c0_14] : memref<1x96xf32, #tpu.memory_space<vmem>>, vector<1x96xf32>
    %33 = vector.shape_cast %32 : vector<1x96xf32> to vector<96xf32>
    %34 = vector.shape_cast %33 : vector<96xf32> to vector<1x96xf32>
    %35 = vector.broadcast %34 : vector<1x96xf32> to vector<16x96xf32>
    %36 = arith.addf %31, %35 : vector<16x96xf32>
    %37 = vector.shape_cast %36 : vector<16x96xf32> to vector<2x8x96xf32>
    %c0_15 = arith.constant 0 : index
    %c0_16 = arith.constant 0 : index
    %c0_17 = arith.constant 0 : index
    %38 = vector.load %arg2[%c0_15, %c0_16, %c0_17] : memref<2x1x8xf32, #tpu.memory_space<vmem>>, vector<2x1x8xf32>
    %cst_18 = arith.constant 0.000000e+00 : f32
    %39 = vector.broadcast %cst_18 : f32 to vector<2x1x8xf32>
    %40 = arith.cmpf oeq, %38, %39 : vector<2x1x8xf32>
    %cst_19 = arith.constant -1.000000e+09 : f32
    %cst_20 = arith.constant 0.000000e+00 : f32
    %41 = vector.broadcast %cst_19 : f32 to vector<2x1x8xf32>
    %42 = vector.broadcast %cst_20 : f32 to vector<2x1x8xf32>
    %43 = arith.select %40, %41, %42 : vector<2x1x8xi1>, vector<2x1x8xf32>
    %c0_21 = arith.constant 0 : index
    %c0_22 = arith.constant 0 : index
    %44 = vector.load %arg7[%c0_21, %c0_22] : memref<32x32xbf16, #tpu.memory_space<vmem>>, vector<32x32xbf16>
    %cst_23 = arith.constant 0.000000e+00 : f32
    %45 = vector.broadcast %cst_23 : f32 to vector<16x32xf32>
    %46 = vector.extract_strided_slice %37 {offsets = [0, 0, 0], sizes = [2, 8, 8], strides = [1, 1, 1]} : vector<2x8x96xf32> to vector<2x8x8xf32>
    %47 = vector.extract_strided_slice %37 {offsets = [0, 0, 32], sizes = [2, 8, 8], strides = [1, 1, 1]} : vector<2x8x96xf32> to vector<2x8x8xf32>
    %48 = vector.extract_strided_slice %37 {offsets = [0, 0, 64], sizes = [2, 8, 8], strides = [1, 1, 1]} : vector<2x8x96xf32> to vector<2x8x8xf32>
    "tpu.trace_start"() <{level = 10 : i32, message = "bqd,bkd->bqk"}> : () -> ()
    %cst_24 = arith.constant dense<0.000000e+00> : vector<2x8x8xf32>
    %49 = tpu.matmul %46, %47, %cst_24 {dimension_numbers = #tpu.dot_dimension_numbers<[2], [2], [1], [1], [0, 0, 0, 1, 1, 1], [0], [0]>} : vector<2x8x8xf32>, vector<2x8x8xf32>, vector<2x8x8xf32> -> vector<2x8x8xf32>
    "tpu.trace_stop"() : () -> ()
    %cst_25 = arith.constant 0.353553385 : f32
    %50 = vector.broadcast %cst_25 : f32 to vector<2x8x8xf32>
    %51 = arith.mulf %49, %50 : vector<2x8x8xf32>
    %52 = vector.broadcast %43 : vector<2x1x8xf32> to vector<2x8x8xf32>
    %53 = arith.addf %51, %52 : vector<2x8x8xf32>
    %cst_26 = arith.constant dense<0xFF800000> : vector<2x8xf32>
    %54 = vector.multi_reduction <maximumf>, %53, %cst_26 [2] : vector<2x8x8xf32> to vector<2x8xf32>
    %55 = vector.shape_cast %54 : vector<2x8xf32> to vector<2x8x1xf32>
    %56 = vector.broadcast %55 : vector<2x8x1xf32> to vector<2x8x8xf32>
    %57 = arith.subf %53, %56 : vector<2x8x8xf32>
    %58 = math.exp %57 : vector<2x8x8xf32>
    %cst_27 = arith.constant dense<0.000000e+00> : vector<2x8xf32>
    %59 = vector.multi_reduction <add>, %58, %cst_27 [2] : vector<2x8x8xf32> to vector<2x8xf32>
    %60 = vector.shape_cast %59 : vector<2x8xf32> to vector<2x8x1xf32>
    %61 = tpu.reciprocal %60 {approx = true} : vector<2x8x1xf32> -> vector<2x8x1xf32>
    %62 = vector.broadcast %61 : vector<2x8x1xf32> to vector<2x8x8xf32>
    %63 = arith.mulf %58, %62 : vector<2x8x8xf32>
    "tpu.trace_start"() <{level = 10 : i32, message = "bqk,bkd->bqd"}> : () -> ()
    %cst_28 = arith.constant dense<0.000000e+00> : vector<2x8x8xf32>
    %64 = tpu.matmul %63, %48, %cst_28 {dimension_numbers = #tpu.dot_dimension_numbers<[2], [1], [1], [2], [0, 0, 0, 1, 1, 2], [0], [0]>} : vector<2x8x8xf32>, vector<2x8x8xf32>, vector<2x8x8xf32> -> vector<2x8x8xf32>
    "tpu.trace_stop"() : () -> ()
    %65 = vector.shape_cast %64 : vector<2x8x8xf32> to vector<16x8xf32>
    %66 = arith.truncf %65 : vector<16x8xf32> to vector<16x8xbf16>
    %67 = vector.extract_strided_slice %44 {offsets = [0, 0], sizes = [8, 32], strides = [1, 1]} : vector<32x32xbf16> to vector<8x32xbf16>
    %cst_29 = arith.constant dense<0.000000e+00> : vector<16x32xf32>
    %68 = tpu.matmul %66, %67, %cst_29 {dimension_numbers = #tpu.dot_dimension_numbers<[1], [0], [0], [1], [0, 0, 1, 1], [], []>} : vector<16x8xbf16>, vector<8x32xbf16>, vector<16x32xf32> -> vector<16x32xf32>
    %69 = arith.addf %45, %68 : vector<16x32xf32>
    %70 = vector.extract_strided_slice %37 {offsets = [0, 0, 8], sizes = [2, 8, 8], strides = [1, 1, 1]} : vector<2x8x96xf32> to vector<2x8x8xf32>
    %71 = vector.extract_strided_slice %37 {offsets = [0, 0, 40], sizes = [2, 8, 8], strides = [1, 1, 1]} : vector<2x8x96xf32> to vector<2x8x8xf32>
    %72 = vector.extract_strided_slice %37 {offsets = [0, 0, 72], sizes = [2, 8, 8], strides = [1, 1, 1]} : vector<2x8x96xf32> to vector<2x8x8xf32>
    "tpu.trace_start"() <{level = 10 : i32, message = "bqd,bkd->bqk"}> : () -> ()
    %cst_30 = arith.constant dense<0.000000e+00> : vector<2x8x8xf32>
    %73 = tpu.matmul %70, %71, %cst_30 {dimension_numbers = #tpu.dot_dimension_numbers<[2], [2], [1], [1], [0, 0, 0, 1, 1, 1], [0], [0]>} : vector<2x8x8xf32>, vector<2x8x8xf32>, vector<2x8x8xf32> -> vector<2x8x8xf32>
    "tpu.trace_stop"() : () -> ()
    %cst_31 = arith.constant 0.353553385 : f32
    %74 = vector.broadcast %cst_31 : f32 to vector<2x8x8xf32>
    %75 = arith.mulf %73, %74 : vector<2x8x8xf32>
    %76 = vector.broadcast %43 : vector<2x1x8xf32> to vector<2x8x8xf32>
    %77 = arith.addf %75, %76 : vector<2x8x8xf32>
    %cst_32 = arith.constant dense<0xFF800000> : vector<2x8xf32>
    %78 = vector.multi_reduction <maximumf>, %77, %cst_32 [2] : vector<2x8x8xf32> to vector<2x8xf32>
    %79 = vector.shape_cast %78 : vector<2x8xf32> to vector<2x8x1xf32>
    %80 = vector.broadcast %79 : vector<2x8x1xf32> to vector<2x8x8xf32>
    %81 = arith.subf %77, %80 : vector<2x8x8xf32>
    %82 = math.exp %81 : vector<2x8x8xf32>
    %cst_33 = arith.constant dense<0.000000e+00> : vector<2x8xf32>
    %83 = vector.multi_reduction <add>, %82, %cst_33 [2] : vector<2x8x8xf32> to vector<2x8xf32>
    %84 = vector.shape_cast %83 : vector<2x8xf32> to vector<2x8x1xf32>
    %85 = tpu.reciprocal %84 {approx = true} : vector<2x8x1xf32> -> vector<2x8x1xf32>
    %86 = vector.broadcast %85 : vector<2x8x1xf32> to vector<2x8x8xf32>
    %87 = arith.mulf %82, %86 : vector<2x8x8xf32>
    "tpu.trace_start"() <{level = 10 : i32, message = "bqk,bkd->bqd"}> : () -> ()
    %cst_34 = arith.constant dense<0.000000e+00> : vector<2x8x8xf32>
    %88 = tpu.matmul %87, %72, %cst_34 {dimension_numbers = #tpu.dot_dimension_numbers<[2], [1], [1], [2], [0, 0, 0, 1, 1, 2], [0], [0]>} : vector<2x8x8xf32>, vector<2x8x8xf32>, vector<2x8x8xf32> -> vector<2x8x8xf32>
    "tpu.trace_stop"() : () -> ()
    %89 = vector.shape_cast %88 : vector<2x8x8xf32> to vector<16x8xf32>
    %90 = arith.truncf %89 : vector<16x8xf32> to vector<16x8xbf16>
    %91 = vector.extract_strided_slice %44 {offsets = [8, 0], sizes = [8, 32], strides = [1, 1]} : vector<32x32xbf16> to vector<8x32xbf16>
    %cst_35 = arith.constant dense<0.000000e+00> : vector<16x32xf32>
    %92 = tpu.matmul %90, %91, %cst_35 {dimension_numbers = #tpu.dot_dimension_numbers<[1], [0], [0], [1], [0, 0, 1, 1], [], []>} : vector<16x8xbf16>, vector<8x32xbf16>, vector<16x32xf32> -> vector<16x32xf32>
    %93 = arith.addf %69, %92 : vector<16x32xf32>
    %94 = vector.extract_strided_slice %37 {offsets = [0, 0, 16], sizes = [2, 8, 8], strides = [1, 1, 1]} : vector<2x8x96xf32> to vector<2x8x8xf32>
    %95 = vector.extract_strided_slice %37 {offsets = [0, 0, 48], sizes = [2, 8, 8], strides = [1, 1, 1]} : vector<2x8x96xf32> to vector<2x8x8xf32>
    %96 = vector.extract_strided_slice %37 {offsets = [0, 0, 80], sizes = [2, 8, 8], strides = [1, 1, 1]} : vector<2x8x96xf32> to vector<2x8x8xf32>
    "tpu.trace_start"() <{level = 10 : i32, message = "bqd,bkd->bqk"}> : () -> ()
    %cst_36 = arith.constant dense<0.000000e+00> : vector<2x8x8xf32>
    %97 = tpu.matmul %94, %95, %cst_36 {dimension_numbers = #tpu.dot_dimension_numbers<[2], [2], [1], [1], [0, 0, 0, 1, 1, 1], [0], [0]>} : vector<2x8x8xf32>, vector<2x8x8xf32>, vector<2x8x8xf32> -> vector<2x8x8xf32>
    "tpu.trace_stop"() : () -> ()
    %cst_37 = arith.constant 0.353553385 : f32
    %98 = vector.broadcast %cst_37 : f32 to vector<2x8x8xf32>
    %99 = arith.mulf %97, %98 : vector<2x8x8xf32>
    %100 = vector.broadcast %43 : vector<2x1x8xf32> to vector<2x8x8xf32>
    %101 = arith.addf %99, %100 : vector<2x8x8xf32>
    %cst_38 = arith.constant dense<0xFF800000> : vector<2x8xf32>
    %102 = vector.multi_reduction <maximumf>, %101, %cst_38 [2] : vector<2x8x8xf32> to vector<2x8xf32>
    %103 = vector.shape_cast %102 : vector<2x8xf32> to vector<2x8x1xf32>
    %104 = vector.broadcast %103 : vector<2x8x1xf32> to vector<2x8x8xf32>
    %105 = arith.subf %101, %104 : vector<2x8x8xf32>
    %106 = math.exp %105 : vector<2x8x8xf32>
    %cst_39 = arith.constant dense<0.000000e+00> : vector<2x8xf32>
    %107 = vector.multi_reduction <add>, %106, %cst_39 [2] : vector<2x8x8xf32> to vector<2x8xf32>
    %108 = vector.shape_cast %107 : vector<2x8xf32> to vector<2x8x1xf32>
    %109 = tpu.reciprocal %108 {approx = true} : vector<2x8x1xf32> -> vector<2x8x1xf32>
    %110 = vector.broadcast %109 : vector<2x8x1xf32> to vector<2x8x8xf32>
    %111 = arith.mulf %106, %110 : vector<2x8x8xf32>
    "tpu.trace_start"() <{level = 10 : i32, message = "bqk,bkd->bqd"}> : () -> ()
    %cst_40 = arith.constant dense<0.000000e+00> : vector<2x8x8xf32>
    %112 = tpu.matmul %111, %96, %cst_40 {dimension_numbers = #tpu.dot_dimension_numbers<[2], [1], [1], [2], [0, 0, 0, 1, 1, 2], [0], [0]>} : vector<2x8x8xf32>, vector<2x8x8xf32>, vector<2x8x8xf32> -> vector<2x8x8xf32>
    "tpu.trace_stop"() : () -> ()
    %113 = vector.shape_cast %112 : vector<2x8x8xf32> to vector<16x8xf32>
    %114 = arith.truncf %113 : vector<16x8xf32> to vector<16x8xbf16>
    %115 = vector.extract_strided_slice %44 {offsets = [16, 0], sizes = [8, 32], strides = [1, 1]} : vector<32x32xbf16> to vector<8x32xbf16>
    %cst_41 = arith.constant dense<0.000000e+00> : vector<16x32xf32>
    %116 = tpu.matmul %114, %115, %cst_41 {dimension_numbers = #tpu.dot_dimension_numbers<[1], [0], [0], [1], [0, 0, 1, 1], [], []>} : vector<16x8xbf16>, vector<8x32xbf16>, vector<16x32xf32> -> vector<16x32xf32>
    %117 = arith.addf %93, %116 : vector<16x32xf32>
    %118 = vector.extract_strided_slice %37 {offsets = [0, 0, 24], sizes = [2, 8, 8], strides = [1, 1, 1]} : vector<2x8x96xf32> to vector<2x8x8xf32>
    %119 = vector.extract_strided_slice %37 {offsets = [0, 0, 56], sizes = [2, 8, 8], strides = [1, 1, 1]} : vector<2x8x96xf32> to vector<2x8x8xf32>
    %120 = vector.extract_strided_slice %37 {offsets = [0, 0, 88], sizes = [2, 8, 8], strides = [1, 1, 1]} : vector<2x8x96xf32> to vector<2x8x8xf32>
    "tpu.trace_start"() <{level = 10 : i32, message = "bqd,bkd->bqk"}> : () -> ()
    %cst_42 = arith.constant dense<0.000000e+00> : vector<2x8x8xf32>
    %121 = tpu.matmul %118, %119, %cst_42 {dimension_numbers = #tpu.dot_dimension_numbers<[2], [2], [1], [1], [0, 0, 0, 1, 1, 1], [0], [0]>} : vector<2x8x8xf32>, vector<2x8x8xf32>, vector<2x8x8xf32> -> vector<2x8x8xf32>
    "tpu.trace_stop"() : () -> ()
    %cst_43 = arith.constant 0.353553385 : f32
    %122 = vector.broadcast %cst_43 : f32 to vector<2x8x8xf32>
    %123 = arith.mulf %121, %122 : vector<2x8x8xf32>
    %124 = vector.broadcast %43 : vector<2x1x8xf32> to vector<2x8x8xf32>
    %125 = arith.addf %123, %124 : vector<2x8x8xf32>
    %cst_44 = arith.constant dense<0xFF800000> : vector<2x8xf32>
    %126 = vector.multi_reduction <maximumf>, %125, %cst_44 [2] : vector<2x8x8xf32> to vector<2x8xf32>
    %127 = vector.shape_cast %126 : vector<2x8xf32> to vector<2x8x1xf32>
    %128 = vector.broadcast %127 : vector<2x8x1xf32> to vector<2x8x8xf32>
    %129 = arith.subf %125, %128 : vector<2x8x8xf32>
    %130 = math.exp %129 : vector<2x8x8xf32>
    %cst_45 = arith.constant dense<0.000000e+00> : vector<2x8xf32>
    %131 = vector.multi_reduction <add>, %130, %cst_45 [2] : vector<2x8x8xf32> to vector<2x8xf32>
    %132 = vector.shape_cast %131 : vector<2x8xf32> to vector<2x8x1xf32>
    %133 = tpu.reciprocal %132 {approx = true} : vector<2x8x1xf32> -> vector<2x8x1xf32>
    %134 = vector.broadcast %133 : vector<2x8x1xf32> to vector<2x8x8xf32>
    %135 = arith.mulf %130, %134 : vector<2x8x8xf32>
    "tpu.trace_start"() <{level = 10 : i32, message = "bqk,bkd->bqd"}> : () -> ()
    %cst_46 = arith.constant dense<0.000000e+00> : vector<2x8x8xf32>
    %136 = tpu.matmul %135, %120, %cst_46 {dimension_numbers = #tpu.dot_dimension_numbers<[2], [1], [1], [2], [0, 0, 0, 1, 1, 2], [0], [0]>} : vector<2x8x8xf32>, vector<2x8x8xf32>, vector<2x8x8xf32> -> vector<2x8x8xf32>
    "tpu.trace_stop"() : () -> ()
    %137 = vector.shape_cast %136 : vector<2x8x8xf32> to vector<16x8xf32>
    %138 = arith.truncf %137 : vector<16x8xf32> to vector<16x8xbf16>
    %139 = vector.extract_strided_slice %44 {offsets = [24, 0], sizes = [8, 32], strides = [1, 1]} : vector<32x32xbf16> to vector<8x32xbf16>
    %cst_47 = arith.constant dense<0.000000e+00> : vector<16x32xf32>
    %140 = tpu.matmul %138, %139, %cst_47 {dimension_numbers = #tpu.dot_dimension_numbers<[1], [0], [0], [1], [0, 0, 1, 1], [], []>} : vector<16x8xbf16>, vector<8x32xbf16>, vector<16x32xf32> -> vector<16x32xf32>
    %141 = arith.addf %117, %140 : vector<16x32xf32>
    %c0_48 = arith.constant 0 : index
    %c0_49 = arith.constant 0 : index
    %142 = vector.load %arg8[%c0_48, %c0_49] : memref<1x32xf32, #tpu.memory_space<vmem>>, vector<1x32xf32>
    %143 = vector.shape_cast %142 : vector<1x32xf32> to vector<32xf32>
    %144 = vector.shape_cast %143 : vector<32xf32> to vector<1x32xf32>
    %145 = vector.broadcast %144 : vector<1x32xf32> to vector<16x32xf32>
    %146 = arith.addf %141, %145 : vector<16x32xf32>
    %147 = arith.addf %1, %146 : vector<16x32xf32>
    %c0_50 = arith.constant 0 : index
    %c0_51 = arith.constant 0 : index
    %148 = vector.load %arg9[%c0_50, %c0_51] : memref<1x32xf32, #tpu.memory_space<vmem>>, vector<1x32xf32>
    %149 = vector.shape_cast %148 : vector<1x32xf32> to vector<32xf32>
    %c0_52 = arith.constant 0 : index
    %c0_53 = arith.constant 0 : index
    %150 = vector.load %arg10[%c0_52, %c0_53] : memref<1x32xf32, #tpu.memory_space<vmem>>, vector<1x32xf32>
    %151 = vector.shape_cast %150 : vector<1x32xf32> to vector<32xf32>
    %cst_54 = arith.constant dense<0.000000e+00> : vector<16xf32>
    %152 = vector.multi_reduction <add>, %147, %cst_54 [1] : vector<16x32xf32> to vector<16xf32>
    %153 = vector.shape_cast %152 : vector<16xf32> to vector<16x1xf32>
    %cst_55 = arith.constant 3.200000e+01 : f32
    %154 = vector.broadcast %cst_55 : f32 to vector<16x1xf32>
    %155 = arith.divf %153, %154 : vector<16x1xf32>
    %156 = vector.broadcast %155 : vector<16x1xf32> to vector<16x32xf32>
    %157 = arith.subf %147, %156 : vector<16x32xf32>
    %158 = arith.mulf %157, %157 : vector<16x32xf32>
    %cst_56 = arith.constant dense<0.000000e+00> : vector<16xf32>
    %159 = vector.multi_reduction <add>, %158, %cst_56 [1] : vector<16x32xf32> to vector<16xf32>
    %160 = vector.shape_cast %159 : vector<16xf32> to vector<16x1xf32>
    %cst_57 = arith.constant 0.0322580636 : f32
    %161 = vector.broadcast %cst_57 : f32 to vector<16x1xf32>
    %162 = arith.mulf %160, %161 : vector<16x1xf32>
    %163 = math.sqrt %162 : vector<16x1xf32>
    %cst_58 = arith.constant 9.99999997E-7 : f32
    %164 = vector.broadcast %cst_58 : f32 to vector<16x1xf32>
    %165 = arith.addf %163, %164 : vector<16x1xf32>
    %166 = tpu.reciprocal %165 {approx = true} : vector<16x1xf32> -> vector<16x1xf32>
    %167 = vector.shape_cast %149 : vector<32xf32> to vector<1x32xf32>
    %168 = vector.broadcast %167 : vector<1x32xf32> to vector<16x32xf32>
    %169 = arith.mulf %168, %157 : vector<16x32xf32>
    %170 = vector.broadcast %166 : vector<16x1xf32> to vector<16x32xf32>
    %171 = arith.mulf %169, %170 : vector<16x32xf32>
    %172 = vector.shape_cast %151 : vector<32xf32> to vector<1x32xf32>
    %173 = vector.broadcast %172 : vector<1x32xf32> to vector<16x32xf32>
    %174 = arith.addf %171, %173 : vector<16x32xf32>
    %175 = arith.truncf %174 : vector<16x32xf32> to vector<16x32xbf16>
    %c0_59 = arith.constant 0 : index
    %c0_60 = arith.constant 0 : index
    %176 = vector.load %arg11[%c0_59, %c0_60] : memref<32x64xbf16, #tpu.memory_space<vmem>>, vector<32x64xbf16>
    %cst_61 = arith.constant dense<0.000000e+00> : vector<16x64xf32>
    %177 = tpu.matmul %175, %176, %cst_61 {dimension_numbers = #tpu.dot_dimension_numbers<[1], [0], [0], [1], [0, 0, 1, 1], [], []>} : vector<16x32xbf16>, vector<32x64xbf16>, vector<16x64xf32> -> vector<16x64xf32>
    %c0_62 = arith.constant 0 : index
    %c0_63 = arith.constant 0 : index
    %178 = vector.load %arg12[%c0_62, %c0_63] : memref<1x64xf32, #tpu.memory_space<vmem>>, vector<1x64xf32>
    %179 = vector.shape_cast %178 : vector<1x64xf32> to vector<64xf32>
    %180 = vector.shape_cast %179 : vector<64xf32> to vector<1x64xf32>
    %181 = vector.broadcast %180 : vector<1x64xf32> to vector<16x64xf32>
    %182 = arith.addf %177, %181 : vector<16x64xf32>
    %cst_64 = arith.constant 0.000000e+00 : f32
    %183 = vector.broadcast %cst_64 : f32 to vector<16x64xf32>
    %184 = arith.maximumf %182, %183 : vector<16x64xf32>
    %185 = arith.truncf %184 : vector<16x64xf32> to vector<16x64xbf16>
    %c0_65 = arith.constant 0 : index
    %c0_66 = arith.constant 0 : index
    %186 = vector.load %arg13[%c0_65, %c0_66] : memref<64x32xbf16, #tpu.memory_space<vmem>>, vector<64x32xbf16>
    %cst_67 = arith.constant dense<0.000000e+00> : vector<16x32xf32>
    %187 = tpu.matmul %185, %186, %cst_67 {dimension_numbers = #tpu.dot_dimension_numbers<[1], [0], [0], [1], [0, 0, 1, 1], [], []>} : vector<16x64xbf16>, vector<64x32xbf16>, vector<16x32xf32> -> vector<16x32xf32>
    %c0_68 = arith.constant 0 : index
    %c0_69 = arith.constant 0 : index
    %188 = vector.load %arg14[%c0_68, %c0_69] : memref<1x32xf32, #tpu.memory_space<vmem>>, vector<1x32xf32>
    %189 = vector.shape_cast %188 : vector<1x32xf32> to vector<32xf32>
    %190 = vector.shape_cast %189 : vector<32xf32> to vector<1x32xf32>
    %191 = vector.broadcast %190 : vector<1x32xf32> to vector<16x32xf32>
    %192 = arith.addf %187, %191 : vector<16x32xf32>
    %193 = arith.addf %147, %192 : vector<16x32xf32>
    %194 = vector.shape_cast %193 : vector<16x32xf32> to vector<2x8x32xf32>
    %c0_70 = arith.constant 0 : index
    %c0_71 = arith.constant 0 : index
    %c0_72 = arith.constant 0 : index
    %195 = vector.load %arg15[%c0_70, %c0_71, %c0_72] : memref<2x8x32xf32, #tpu.memory_space<vmem>>, vector<2x8x32xf32>
    tpu.vector_store %arg15[%c0_70, %c0_71, %c0_72], %194 {strides = array<i32>} : memref<2x8x32xf32, #tpu.memory_space<vmem>>, vector<2x8x32xf32>,
    return
  }
  func.func @transform_0(%arg0: i32) -> (i32, i32, i32) {
    %c0_i32 = arith.constant 0 : i32
    %c0_i32_0 = arith.constant 0 : i32
    %c0_i32_1 = arith.constant 0 : i32
    return %arg0, %c0_i32, %c0_i32_0 : i32, i32, i32
  }
  func.func @transform_1(%arg0: i32) -> (i32, i32, i32) {
    %c0_i32 = arith.constant 0 : i32
    %c0_i32_0 = arith.constant 0 : i32
    %c0_i32_1 = arith.constant 0 : i32
    return %arg0, %c0_i32, %c0_i32_0 : i32, i32, i32
  }
  func.func @transform_2(%arg0: i32) -> (i32, i32) {
    %c0_i32 = arith.constant 0 : i32
    %c0_i32_0 = arith.constant 0 : i32
    %c0_i32_1 = arith.constant 0 : i32
    return %c0_i32, %c0_i32_0 : i32, i32
  }
  func.func @transform_3(%arg0: i32) -> (i32, i32) {
    %c0_i32 = arith.constant 0 : i32
    %c0_i32_0 = arith.constant 0 : i32
    %c0_i32_1 = arith.constant 0 : i32
    return %c0_i32, %c0_i32_0 : i32, i32
  }
  func.func @transform_4(%arg0: i32) -> (i32, i32) {
    %c0_i32 = arith.constant 0 : i32
    %c0_i32_0 = arith.constant 0 : i32
    %c0_i32_1 = arith.constant 0 : i32
    return %c0_i32, %c0_i32_0 : i32, i32
  }
  func.func @transform_5(%arg0: i32) -> (i32, i32) {
    %c0_i32 = arith.constant 0 : i32
    %c0_i32_0 = arith.constant 0 : i32
    %c0_i32_1 = arith.constant 0 : i32
    return %c0_i32, %c0_i32_0 : i32, i32
  }
  func.func @transform_6(%arg0: i32) -> (i32, i32) {
    %c0_i32 = arith.constant 0 : i32
    %c0_i32_0 = arith.constant 0 : i32
    %c0_i32_1 = arith.constant 0 : i32
    return %c0_i32, %c0_i32_0 : i32, i32
  }
  func.func @transform_7(%arg0: i32) -> (i32, i32) {
    %c0_i32 = arith.constant 0 : i32
    %c0_i32_0 = arith.constant 0 : i32
    %c0_i32_1 = arith.constant 0 : i32
    return %c0_i32, %c0_i32_0 : i32, i32
  }
  func.func @transform_8(%arg0: i32) -> (i32, i32) {
    %c0_i32 = arith.constant 0 : i32
    %c0_i32_0 = arith.constant 0 : i32
    %c0_i32_1 = arith.constant 0 : i32
    return %c0_i32, %c0_i32_0 : i32, i32
  }
  func.func @transform_9(%arg0: i32) -> (i32, i32) {
    %c0_i32 = arith.constant 0 : i32
    %c0_i32_0 = arith.constant 0 : i32
    %c0_i32_1 = arith.constant 0 : i32
    return %c0_i32, %c0_i32_0 : i32, i32
  }
  func.func @transform_10(%arg0: i32) -> (i32, i32) {
    %c0_i32 = arith.constant 0 : i32
    %c0_i32_0 = arith.constant 0 : i32
    %c0_i32_1 = arith.constant 0 : i32
    return %c0_i32, %c0_i32_0 : i32, i32
  }
  func.func @transform_11(%arg0: i32) -> (i32, i32) {
    %c0_i32 = arith.constant 0 : i32
    %c0_i32_0 = arith.constant 0 : i32
    %c0_i32_1 = arith.constant 0 : i32
    return %c0_i32, %c0_i32_0 : i32, i32
  }
  func.func @transform_12(%arg0: i32) -> (i32, i32) {
    %c0_i32 = arith.constant 0 : i32
    %c0_i32_0 = arith.constant 0 : i32
    %c0_i32_1 = arith.constant 0 : i32
    return %c0_i32, %c0_i32_0 : i32, i32
  }
  func.func @transform_13(%arg0: i32) -> (i32, i32) {
    %c0_i32 = arith.constant 0 : i32
    %c0_i32_0 = arith.constant 0 : i32
    %c0_i32_1 = arith.constant 0 : i32
    return %c0_i32, %c0_i32_0 : i32, i32
  }
  func.func @transform_14(%arg0: i32) -> (i32, i32, i32) {
    %c0_i32 = arith.constant 0 : i32
    %c0_i32_0 = arith.constant 0 : i32
    %c0_i32_1 = arith.constant 0 : i32
    return %arg0, %c0_i32, %c0_i32_0 : i32, i32, i32
  }
}

</mosaic_0001>

<bundles_post_ra>
// kernel: tpu_custom_call.1
= control target key start
LH: loop header
LB: loop body
LE: loop exit
PB: predicated region body
PF: predicated region fallthrough
CT: control target
= control target key end

     0   :  { %19 = vsyncpa [#allocation3], 0  ;;  %s2748_s0 = inlined_call_operand.hbm [shape: f32[2,8,32], index: 0, kind: input, shape index: {}, may-alias: {0,14}]   ;;  %s2749_s1 = inlined_call_operand.vmem [shape: f32[2,1,8], index: 1, kind: input, shape index: {}]   ;;  %s2750_s2 = inlined_call_operand.vmem [shape: f32[1,32], index: 2, kind: input, shape index: {}]   ;;  %s2751_s3 = inlined_call_operand.vmem [shape: f32[1,32], index: 3, kind: input, shape index: {}]   ;;  %s2752_s4 = inlined_call_operand.vmem [shape: bf16[32,96], index: 4, kind: input, shape index: {}]   ;;  %s2753_s5 = inlined_call_operand.vmem [shape: f32[1,96], index: 5, kind: input, shape index: {}]   ;;  %s2754_s6 = inlined_call_operand.vmem [shape: bf16[32,32], index: 6, kind: input, shape index: {}]   ;;  %s2755_s7 = inlined_call_operand.vmem [shape: f32[1,32], index: 7, kind: input, shape index: {}]   ;;  %s2756_s8 = inlined_call_operand.vmem [shape: f32[1,32], index: 8, kind: input, shape index: {}]   ;;  %s2757_s9 = inlined_call_operand.vmem [shape: f32[1,32], index: 9, kind: input, shape index: {}]   ;;  %s2758_s10 = inlined_call_operand.vmem [shape: bf16[32,64], index: 10, kind: input, shape index: {}]   ;;  %s2759_s11 = inlined_call_operand.vmem [shape: f32[1,64], index: 11, kind: input, shape index: {}]   ;;  %s2760_s12 = inlined_call_operand.vmem [shape: bf16[64,32], index: 12, kind: input, shape index: {}]   ;;  %s2761_s13 = inlined_call_operand.vmem [shape: f32[1,32], index: 13, kind: input, shape index: {}]   ;;  %s2762_s14 = inlined_call_operand.hbm [shape: f32[2,8,32], index: 14, kind: output, shape index: {}, may-alias: {0,14}]  }
   0x1   :  { %20 = vsyncpa [#allocation4], 0  ;;  %s2343_s29 = smov [#allocation2]   ;;  %s2295_s17 = scalar_lea.hbm %s2748_s0, 256 }
   0x2   :  { %s26_s30 = sshll.u32 %s2343_s29, 4  ;;  %p2296_p0 = scmp.ne.s32.totalorder %s2748_s0, %s2295_s17  ;;  %s27_s30 = int_to_ptr.vmem [resolvable:$true] %s26_s30 }
   0x3   :  { %p2299_p1 = scmp.lt.u32.totalorder %s2295_s17, %s2748_s0 }
   0x5   :  { %p2301_p2 = pnand %p2299_p1, %p2296_p0 }
   0x7   :  { %2304 = shalt.err (!%p2301_p2)
}
   0x8   :  { %s2305_s22 = scalar_lea.vmem %s27_s30, 256  ;;  %p2310_p4 = scmp.lt.s32.totalorder %s27_s30, %s27_s30 }
   0x9   :  { %p2306_p3 = scmp.ne.s32.totalorder %s27_s30, %s2305_s22  ;;  %p2311_p5 = scmp.lt.s32.totalorder %s2305_s22, %s2305_s22 }
   0xb   :  { %p2312_p6 = por %p2311_p5, %p2310_p4 }
   0xd   :  { %p2313_p7 = pnand %p2312_p6, %p2306_p3 }
   0xf   :  { %2316 = shalt.err (!%p2313_p7)
}
  0x10   :  { %s2344_s23 = smov 128   ;;  %s2345_s24 = smov 8  }
  0x11   :  { %32 = dma.hbm_to_vmem [thread:$0]  %s2748_s0, 256, %s27_s30, [#allocation3], %s2344_s23, %s2344_s23, %s2345_s24  }
  0x12   :  { %2339 = dma.done.wait [#allocation3], 256  }
  0x13   :  { %2340 = vsyncadd [#allocation3], 4294967040  ;;  %vm67_vm0 = vcmask 261120   ;;  %v2450_v0 = vld [vmem:[#allocation2] sm:$0xff]  ;;  %v2452_v1 = vld [vmem:[#allocation2 + $0x8] sm:$0xff]  ;;  %v2346_v15 = vmov 0.0   ;;  %v362_v53 = vlaneseq }
  0x14   :  { %v68_v2 = vsel %vm67_vm0, %v2450_v0, 0.0  ;;  %v71_v3 = vsel %vm67_vm0, %v2452_v1, 0.0  ;;  %v2239_v14 = vld [vmem:[%s2752_s4] sm:$0xff]   ;;  %2090 = vmatprep.subr.bf16.mxu0 %v2346_v15  ;;  %vm2347_vm1 = vmmov 0   ;;  %v2240_v16 = vld [vmem:[%s2752_s4 + $0x8] sm:$0xff]   ;;  %2103 = vmatprep.subr.mxu1 %v2346_v15  ;;  %vm206_vm6 = vcmask 64512  }
  0x15   :  { %69 = vadd.xlane.f32.xlu0 %v68_v2  ;;  %2094 = vmatprep.mubr.msk.bf16.mxu0 %vm2347_vm1, %v2346_v15  ;;  %v1992_v33 = vld [vmem:[%s2750_s2] ss:$0 sm:$0xff]  ;;  %v363_v55 = vshrl.u32 %v362_v53, 7  ;;  %v194_v56 = vld [vmem:[%s2749_s1 + $0x1] sm:$0x1]  ;;  %s2350_s21 = smov 88  }
  0x16   :  { %2091 = vmatpush3.bf16.msra.mxu0 %v2239_v14  ;;  %2105 = vmatprep.mubr.msk.f32.mxu1 %vm2347_vm1, %v2346_v15  ;;  %v1993_v39 = vld [vmem:[%s2751_s3] ss:$0 sm:$0xff]  ;;  %s2348_s3 = smov 96   ;;  %vm196_vm8 = vcmp.eq.f32.partialorder %v194_v56, 0.0  ;;  %s2351_s22 = smov 120   ;;  %vm887_vm9 = vcmask 1043456  }
  0x17   :  { %2092 = vmatprep.subr.bf16.mxu0 %v2346_v15  ;;  %v1994_v44 = vld [vmem:[%s2753_s5] ss:$0 sm:$0xff]  ;;  %v364_v57 = vsub.s32 0, %v363_v55  ;;  %v198_v59 = vsel %vm196_vm8, -1e+09, %v2346_v15  ;;  %s2352_s25 = smov 56  }
  0x18   :  { %v193_v54 = vld [vmem:[%s2749_s1] sm:$0x1]  ;;  %s2349_s1 = smov 64   ;;  %s2353_s26 = smov 80   ;;  %vm1926_vm14 = vcmask 523264  }
  0x19   :  { %72 = vadd.xlane.f32.xlu0 %v71_v3  ;;  %vm195_vm7 = vcmp.eq.f32.partialorder %v193_v54, 0.0  ;;  %v2516_v2 = vrot.slane %v198_v59, %v364_v57  ;;  %s2354_s0 = smov 112   ;;  %s2355_s27 = smov 72  }
  0x1a   :  { %2093 = vmatpush3.bf16.msra.mxu0 %v2240_v16  ;;  %v197_v58 = vsel %vm195_vm7, -1e+09, %v2346_v15  ;;  %s2356_s15 = smov 48   ;;  %s2357_s16 = smov 104  }
  0x1b   :  { %2098 = vmatprep.subr.mxu0 %v2346_v15  ;;  %v2514_v60 = vrot.slane %v197_v58, %v364_v57  ;;  %s2358_s17 = smov 40  }
  0xa2   :  { %v70_v4 = vpop.xlane.xlu0 %69 }
  0xa3   :  { %v75_v5 = vmul.f32 0.03125, %v70_v4 }
  0xa5   :  { %v77_v6 = vsub.f32 %v2450_v0, %v75_v5 }
  0xa6   :  { %v73_v7 = vpop.xlane.xlu0 %72 }
  0xa7   :  { %v76_v8 = vmul.f32 0.03125, %v73_v7  ;;  %v79_v9 = vmul.f32 %v77_v6, %v77_v6  ;;  %v113_v35 = vmul.f32 %v1992_v33, %v77_v6 }
  0xa9   :  { %v78_v10 = vsub.f32 %v2452_v1, %v76_v8  ;;  %v81_v11 = vsel %vm67_vm0, %v79_v9, 0.0 }
  0xaa   :  { %82 = vadd.xlane.f32.xlu1 %v81_v11 }
  0xab   :  { %v80_v12 = vmul.f32 %v78_v10, %v78_v10  ;;  %v114_v36 = vmul.f32 %v1992_v33, %v78_v10 }
  0xad   :  { %v84_v13 = vsel %vm67_vm0, %v80_v12, 0.0 }
  0xae   :  { %85 = vadd.xlane.f32.xlu1 %v84_v13 }
 0x137   :  { %v83_v17 = vpop.xlane.xlu1 %82 }
 0x138   :  { %v87_v18 = vmul.f32 0.032258064, %v83_v17 }
 0x13a   :  { %2247 = vrsqrt.f32 %v87_v18  ;;  %vm91_vm2 = vcmp.eq.f32.partialorder %v87_v18, inf  ;;  %v94_v23 = vand.u32 2147483648, %v87_v18  ;;  %vm93_vm3 = vcmp.eq.f32.partialorder %v87_v18, 0.0 }
 0x13b   :  { %v86_v19 = vpop.xlane.xlu1 %85 }
 0x13c   :  { %v88_v20 = vmul.f32 0.032258064, %v86_v19 }
 0x13e   :  { %2249 = vrsqrt.f32 %v88_v20  ;;  %vm98_vm4 = vcmp.eq.f32.partialorder %v88_v20, inf  ;;  %v101_v29 = vand.u32 2147483648, %v88_v20  ;;  %vm100_vm5 = vcmp.eq.f32.partialorder %v88_v20, 0.0 }
 0x144   :  { %v2248_v21 = vpop.eup %2247 }
 0x145   :  { %v90_v22 = vmul.f32 %v2248_v21, %v87_v18 }
 0x147   :  { %v92_v24 = vsel %vm91_vm2, %v87_v18, %v90_v22 }
 0x148   :  { %v2250_v25 = vpop.eup %2249  ;;  %v95_v26 = vsel %vm93_vm3, %v94_v23, %v92_v24 }
 0x149   :  { %v103_v27 = vadd.f32 1e-06, %v95_v26  ;;  %v97_v28 = vmul.f32 %v2250_v25, %v88_v20 }
 0x14b   :  { %2251 = vrcp.f32 %v103_v27  ;;  %v99_v30 = vsel %vm98_vm4, %v88_v20, %v97_v28 }
 0x14c   :  { %v102_v31 = vsel %vm100_vm5, %v101_v29, %v99_v30 }
 0x14d   :  { %v104_v32 = vadd.f32 1e-06, %v102_v31 }
 0x14f   :  { %2253 = vrcp.f32 %v104_v32 }
 0x155   :  { %v2252_v34 = vpop.eup %2251 }
 0x156   :  { %v115_v37 = vmul.f32 %v2252_v34, %v113_v35 }
 0x158   :  { %v123_v41 = vadd.f32 %v1993_v39, %v115_v37 }
 0x159   :  { %v2254_v38 = vpop.eup %2253 }
 0x15a   :  { %v116_v40 = vmul.f32 %v2254_v38, %v114_v36 }
 0x15c   :  { %v124_v42 = vadd.f32 %v1993_v39, %v116_v40 }
 0x15e   :  { %v125_v43 = vpack.c.bf16 %v124_v42, %v123_v41 }
 0x160   :  { %2095 = vmatmul.mubr.msk.bf16.vlgmr.msra.gmra.mrb[0].mxu0 %vm67_vm0, %v125_v43 }
 0x161   :  { %2100 = vmatprep.mubr.msk.f32.mxu0 %vm2347_vm1, %v2346_v15 }
 0x233   :  { %v186_v45 = vpop.f32.mrb[0].mxu0 }
 0x234   :  { %v2488_v46 = vadd.f32 %v1994_v44, %v186_v45  ;;  %v2096_v47 = vpop.f32.mrb[1].mxu0 }
 0x235   :  { %v189_v48 = vpop.f32.mrb[2].mxu0 }
 0x236   :  { %v2490_v49 = vadd.f32 %v1994_v44, %v189_v48  ;;  %204 = vrot.lane.b32.xlu0 %v2488_v46, %s2348_s3  ;;  %v2097_v50 = vpop.f32.mrb[3].mxu0 }
 0x238   :  { %282 = vrot.lane.b32.xlu1 %v2490_v49, %s2348_s3 }
 0x2a8   :  { %v205_v51 = vpop.permute.xlu0 %204 }
 0x2a9   :  { %2099 = vmatpush3.xpose.msk.msra.mxu0 %vm206_vm6, %v205_v51 }
 0x2aa   :  { %v283_v52 = vpop.permute.xlu1 %282  ;;  %2113 = vmatprep.subr.mxu0 %v2346_v15 }
 0x2ab   :  { %2104 = vmatpush3.xpose.msk.msra.mxu1 %vm206_vm6, %v283_v52 }
 0x2ac   :  { %2101 = vmatmul.mubr.msk.f32.vlgmr.msra.gmra.mrb[4].mxu0 %vm206_vm6, %v2488_v46  ;;  %2108 = vmatprep.subr.mxu1 %v2346_v15 }
 0x2ad   :  { %2115 = vmatprep.mubr.msk.f32.mxu0 %vm2347_vm1, %v2346_v15 }
 0x2ae   :  { %2106 = vmatmul.mubr.msk.f32.vlgmr.msra.gmra.mrb[0].mxu1 %vm206_vm6, %v2490_v49 }
 0x2af   :  { %2110 = vmatprep.mubr.msk.f32.mxu1 %vm2347_vm1, %v2346_v15 }
 0x37f   :  { %v277_v61 = vpop.f32.mrb[4].mxu0 }
 0x380   :  { %v358_v62 = vmul.f32 0.35355338, %v277_v61  ;;  %v2102_v63 = vpop.f32.mrb[5].mxu0 }
 0x381   :  { %v354_v3 = vpop.f32.mrb[0].mxu1 }
 0x382   :  { %v359_v4 = vmul.f32 0.35355338, %v354_v3  ;;  %v2107_v5 = vpop.f32.mrb[1].mxu1  ;;  %v372_v6 = vadd.f32 %v2514_v60, %v358_v62 }
 0x384   :  { %v374_v7 = vsel %vm206_vm6, %v372_v6, -inf  ;;  %v373_v8 = vadd.f32 %v2516_v2, %v359_v4  ;;  %v200_v4 = vld [vmem:[%s2754_s6 + $0x4] sm:$0xf] }
 0x385   :  { %375 = vmax.xlane.f32.xlu1 %v374_v7  ;;  %v889_v7 = vsel %vm887_vm9, %v200_v4, 0 }
 0x386   :  { %v377_v9 = vsel %vm206_vm6, %v373_v8, -inf }
 0x387   :  { %378 = vmax.xlane.f32.xlu0 %v377_v9 }
 0x396   :  { %472 = vrot.lane.b32.xlu1 %v2490_v49, %s2349_s1 }
 0x39a   :  { %551 = vrot.lane.b32.xlu1 %v2488_v46, %s2350_s21 }
 0x39d   :  { %396 = vrot.lane.b32.xlu0 %v2488_v46, %s2349_s1 }
 0x39e   :  { %629 = vrot.lane.b32.xlu1 %v2490_v49, %s2350_s21 }
 0x412   :  { %v376_v10 = vpop.xlane.xlu1 %375 }
 0x413   :  { %v380_v11 = vsub.f32 %v372_v6, %v376_v10 }
 0x414   :  { %v379_v12 = vpop.xlane.xlu0 %378 }
 0x415   :  { %v382_v13 = vmul.f32 1.442695, %v380_v11  ;;  %v381_v14 = vsub.f32 %v373_v8, %v379_v12  ;;  %v199_v8 = vld [vmem:[%s2754_s6] sm:$0xf] }
 0x416   :  { %v473_v16 = vpop.permute.xlu1 %472  ;;  %v936_v11 = vsel %vm887_vm9, %v199_v8, 0 }
 0x417   :  { %2255 = vpow2.f32 %v382_v13  ;;  %v384_v17 = vmul.f32 1.442695, %v381_v14  ;;  %2114 = vmatpush3.msra.mxu0 %v473_v16 }
 0x418   :  { %v397_v18 = vpop.permute.xlu0 %396  ;;  %2123 = vmatprep.subr.mxu0 %v2346_v15 }
 0x419   :  { %2257 = vpow2.f32 %v384_v17  ;;  %2109 = vmatpush3.msra.mxu1 %v397_v18 }
 0x41a   :  { %2118 = vmatprep.subr.mxu1 %v2346_v15  ;;  %v552_v23 = vpop.permute.xlu1 %551 }
 0x41e   :  { %v630_v24 = vpop.permute.xlu1 %629 }
 0x421   :  { %v2256_v19 = vpop.eup %2255 }
 0x422   :  { %v386_v20 = vsel %vm206_vm6, %v2256_v19, 0.0 }
 0x423   :  { %v2258_v21 = vpop.eup %2257  ;;  %387 = vadd.xlane.f32.xlu0 %v386_v20 }
 0x424   :  { %v389_v22 = vsel %vm206_vm6, %v2258_v21, 0.0 }
 0x425   :  { %390 = vadd.xlane.f32.xlu1 %v389_v22 }
 0x436   :  { %627 = vrot.lane.b32.xlu1 %v2490_v49, %s2351_s22 }
 0x439   :  { %549 = vrot.lane.b32.xlu0 %v2488_v46, %s2351_s22 }
 0x4b0   :  { %v388_v25 = vpop.xlane.xlu0 %387 }
 0x4b1   :  { %2259 = vrcp.f32 %v388_v25 }
 0x4b2   :  { %v391_v26 = vpop.xlane.xlu1 %390 }
 0x4b3   :  { %2261 = vrcp.f32 %v391_v26 }
 0x4b4   :  { %v550_v31 = vpop.permute.xlu0 %549 }
 0x4b6   :  { %v628_v32 = vpop.permute.xlu1 %627 }
 0x4bb   :  { %v2260_v27 = vpop.eup %2259 }
 0x4bc   :  { %v394_v28 = vmul.f32 %v2260_v27, %v2256_v19 }
 0x4bd   :  { %v2262_v29 = vpop.eup %2261 }
 0x4be   :  { %v395_v30 = vmul.f32 %v2262_v29, %v2258_v21  ;;  %2111 = vmatmul.mubr.msk.f32.vlgmr.msra.gmra.mrb[2].mxu1 %vm206_vm6, %v394_v28 }
 0x4bf   :  { %2119 = vmatpush3.xpose.msk.msra.mxu1 %vm206_vm6, %v552_v23  ;;  %2120 = vmatprep.mubr.msk.f32.mxu1 %vm2347_vm1, %v2346_v15 }
 0x4c0   :  { %2116 = vmatmul.mubr.msk.f32.vlgmr.msra.gmra.mrb[6].mxu0 %vm206_vm6, %v395_v30  ;;  %2128 = vmatprep.subr.mxu1 %v2346_v15 }
 0x4c1   :  { %2124 = vmatpush3.xpose.msk.msra.mxu0 %vm206_vm6, %v630_v24  ;;  %2125 = vmatprep.mubr.msk.f32.mxu0 %vm2347_vm1, %v2346_v15 }
 0x4c2   :  { %2121 = vmatmul.mubr.msk.f32.vlgmr.msra.gmra.mrb[4].mxu1 %vm206_vm6, %v550_v31  ;;  %2133 = vmatprep.subr.mxu0 %v2346_v15 }
 0x4c3   :  { %2130 = vmatprep.mubr.msk.f32.mxu1 %vm2347_vm1, %v2346_v15 }
 0x4c4   :  { %2126 = vmatmul.mubr.msk.f32.vlgmr.msra.gmra.mrb[8].mxu0 %vm206_vm6, %v628_v32 }
 0x4c5   :  { %2135 = vmatprep.mubr.msk.f32.mxu0 %vm2347_vm1, %v2346_v15 }
 0x591   :  { %v2548_v33 = vpop.f32.mrb[2].mxu1 }
 0x592   :  { %v2112_v34 = vpop.f32.mrb[3].mxu1 }
 0x593   :  { %v2550_v35 = vpop.f32.mrb[6].mxu0 }
 0x594   :  { %v548_v36 = vpack.c.bf16 %v2550_v35, %v2548_v33  ;;  %v2117_v37 = vpop.f32.mrb[7].mxu0 }
 0x595   :  { %v623_v38 = vpop.f32.mrb[4].mxu1 }
 0x596   :  { %v705_v39 = vmul.f32 0.35355338, %v623_v38  ;;  %v2122_v40 = vpop.f32.mrb[5].mxu1 }
 0x597   :  { %v701_v41 = vpop.f32.mrb[8].mxu0 }
 0x598   :  { %v706_v42 = vmul.f32 0.35355338, %v701_v41  ;;  %v2127_v43 = vpop.f32.mrb[9].mxu0  ;;  %v707_v44 = vadd.f32 %v705_v39, %v2514_v60 }
 0x59a   :  { %v709_v45 = vsel %vm206_vm6, %v707_v44, -inf  ;;  %v708_v47 = vadd.f32 %v706_v42, %v2516_v2 }
 0x59b   :  { %710 = vmax.xlane.f32.xlu0 %v709_v45 }
 0x59c   :  { %v712_v48 = vsel %vm206_vm6, %v708_v47, -inf }
 0x59d   :  { %713 = vmax.xlane.f32.xlu1 %v712_v48 }
 0x5ae   :  { %807 = vrot.lane.b32.xlu1 %v2490_v49, %s2352_s25 }
 0x5b2   :  { %1059 = vrot.lane.b32.xlu1 %v2490_v49, %s2353_s26 }
 0x5b6   :  { %1057 = vrot.lane.b32.xlu1 %v2490_v49, %s2354_s0 }
 0x5ba   :  { %979 = vrot.lane.b32.xlu1 %v2488_v46, %s2354_s0 }
 0x5be   :  { %1365 = vrot.lane.b32.xlu1 %v2488_v46, %s2355_s27 }
 0x628   :  { %v711_v50 = vpop.xlane.xlu0 %710 }
 0x629   :  { %v715_v51 = vsub.f32 %v707_v44, %v711_v50 }
 0x62a   :  { %v714_v52 = vpop.xlane.xlu1 %713 }
 0x62b   :  { %v717_v53 = vmul.f32 1.442695, %v715_v51  ;;  %v716_v54 = vsub.f32 %v708_v47, %v714_v52 }
 0x62d   :  { %2263 = vpow2.f32 %v717_v53  ;;  %v719_v55 = vmul.f32 1.442695, %v716_v54 }
 0x62e   :  { %v808_v56 = vpop.permute.xlu1 %807 }
 0x62f   :  { %2265 = vpow2.f32 %v719_v55  ;;  %2134 = vmatpush3.msra.mxu0 %v808_v56 }
 0x630   :  { %2144 = vmatprep.subr.bf16.mxu0 %v2346_v15 }
 0x632   :  { %v1060_v12 = vpop.permute.xlu1 %1059 }
 0x636   :  { %v1058_v13 = vpop.permute.xlu1 %1057 }
 0x637   :  { %v2264_v57 = vpop.eup %2263 }
 0x638   :  { %v721_v58 = vsel %vm206_vm6, %v2264_v57, 0.0 }
 0x639   :  { %v2266_v59 = vpop.eup %2265  ;;  %722 = vadd.xlane.f32.xlu0 %v721_v58 }
 0x63a   :  { %v724_v61 = vsel %vm206_vm6, %v2266_v59, 0.0  ;;  %v980_v25 = vpop.permute.xlu1 %979 }
 0x63d   :  { %725 = vadd.xlane.f32.xlu0 %v724_v61 }
 0x63e   :  { %v1366_v50 = vpop.permute.xlu1 %1365 }
 0x653   :  { %731 = vrot.lane.b32.xlu0 %v2488_v46, %s2352_s25 }
 0x657   :  { %981 = vrot.lane.b32.xlu0 %v2488_v46, %s2353_s26 }
 0x6c6   :  { %v723_v62 = vpop.xlane.xlu0 %722 }
 0x6c7   :  { %2267 = vrcp.f32 %v723_v62 }
 0x6ca   :  { %v726_v63 = vpop.xlane.xlu0 %725 }
 0x6cb   :  { %2269 = vrcp.f32 %v726_v63 }
 0x6ce   :  { %v732_v3 = vpop.permute.xlu0 %731 }
 0x6cf   :  { %2129 = vmatpush3.msra.mxu1 %v732_v3 }
 0x6d0   :  { %2138 = vmatprep.subr.bf16.mxu1 %v2346_v15 }
 0x6d1   :  { %v2268_v5 = vpop.eup %2267 }
 0x6d2   :  { %v729_v6 = vmul.f32 %v2268_v5, %v2264_v57  ;;  %v982_v20 = vpop.permute.xlu0 %981 }
 0x6d4   :  { %2131 = vmatmul.mubr.msk.f32.vlgmr.msra.gmra.mrb[6].mxu1 %vm206_vm6, %v729_v6 }
 0x6d5   :  { %v2270_v9 = vpop.eup %2269  ;;  %2139 = vmatpush3.bf16.msra.mxu1 %v889_v7  ;;  %2140 = vmatprep.mubr.msk.bf16.mxu1 %vm2347_vm1, %v2346_v15 }
 0x6d6   :  { %v730_v10 = vmul.f32 %v2270_v9, %v2266_v59  ;;  %2150 = vmatprep.subr.mxu1 %v2346_v15 }
 0x6d8   :  { %2136 = vmatmul.mubr.msk.f32.vlgmr.msra.gmra.mrb[10].mxu0 %vm206_vm6, %v730_v10 }
 0x6d9   :  { %2145 = vmatpush3.bf16.msra.mxu0 %v936_v11  ;;  %2146 = vmatprep.mubr.msk.bf16.mxu0 %vm2347_vm1, %v2346_v15 }
 0x6da   :  { %2155 = vmatprep.subr.mxu0 %v2346_v15 }
 0x6dc   :  { %2147 = vmatmul.mubr.msk.bf16.vlgmr.msra.gmra.mrb[12].mxu0 %vm206_vm6, %v548_v36 }
 0x6dd   :  { %2157 = vmatprep.mubr.msk.f32.mxu0 %vm2347_vm1, %v2346_v15 }
 0x6e2   :  { %2156 = vmatpush3.xpose.msk.msra.mxu0 %vm206_vm6, %v1060_v12 }
 0x6e3   :  { %2165 = vmatprep.subr.mxu0 %v2346_v15 }
 0x6e5   :  { %2158 = vmatmul.mubr.msk.f32.vlgmr.msra.gmra.mrb[16].mxu0 %vm206_vm6, %v1058_v13 }
 0x6e6   :  { %2167 = vmatprep.mubr.msk.f32.mxu0 %vm2347_vm1, %v2346_v15 }
 0x7a7   :  { %v803_v14 = vpop.f32.mrb[6].mxu1 }
 0x7a8   :  { %v2132_v16 = vpop.f32.mrb[7].mxu1 }
 0x7ab   :  { %v879_v17 = vpop.f32.mrb[10].mxu0 }
 0x7ac   :  { %v883_v18 = vpack.c.bf16 %v879_v17, %v803_v14  ;;  %v2137_v19 = vpop.f32.mrb[11].mxu0 }
 0x7ad   :  { %v201_v19 = vld [vmem:[%s2754_s6 + $0x8] sm:$0xf] }
 0x7ae   :  { %2141 = vmatmul.mubr.msk.bf16.vlgmr.msra.gmra.mrb[8].mxu1 %vm206_vm6, %v883_v18 }
 0x7af   :  { %2151 = vmatpush3.xpose.msk.msra.mxu1 %vm206_vm6, %v982_v20  ;;  %v972_v21 = vpop.f32.mrb[12].mxu0  ;;  %2152 = vmatprep.mubr.msk.f32.mxu1 %vm2347_vm1, %v2346_v15  ;;  %v1318_v20 = vsel %vm887_vm9, %v201_v19, 0 }
 0x7b0   :  { %v2148_v22 = vpop.f32.mrb[13].mxu0  ;;  %2160 = vmatprep.subr.mxu1 %v2346_v15 }
 0x7b1   :  { %v975_v23 = vpop.f32.mrb[14].mxu0 }
 0x7b2   :  { %v2149_v24 = vpop.f32.mrb[15].mxu0 }
 0x7b6   :  { %2153 = vmatmul.mubr.msk.f32.vlgmr.msra.gmra.mrb[12].mxu1 %vm206_vm6, %v980_v25 }
 0x7b7   :  { %2162 = vmatprep.mubr.msk.f32.mxu1 %vm2347_vm1, %v2346_v15 }
 0x7b8   :  { %v1131_v26 = vpop.f32.mrb[16].mxu0 }
 0x7b9   :  { %v1136_v27 = vmul.f32 0.35355338, %v1131_v26  ;;  %v2159_v28 = vpop.f32.mrb[17].mxu0 }
 0x7bb   :  { %v1138_v29 = vadd.f32 %v1136_v27, %v2516_v2 }
 0x7bd   :  { %v1142_v30 = vsel %vm206_vm6, %v1138_v29, -inf }
 0x7be   :  { %1143 = vmax.xlane.f32.xlu0 %v1142_v30 }
 0x7d4   :  { %1237 = vrot.lane.b32.xlu0 %v2490_v49, %s2356_s15 }
 0x7d8   :  { %1363 = vrot.lane.b32.xlu0 %v2488_v46, %s2357_s16 }
 0x7dc   :  { %1441 = vrot.lane.b32.xlu0 %v2490_v49, %s2357_s16 }
 0x84b   :  { %v1144_v31 = vpop.xlane.xlu0 %1143 }
 0x84c   :  { %v1146_v32 = vsub.f32 %v1138_v29, %v1144_v31 }
 0x84e   :  { %v1149_v33 = vmul.f32 1.442695, %v1146_v32 }
 0x84f   :  { %v1238_v34 = vpop.permute.xlu0 %1237 }
 0x850   :  { %2271 = vpow2.f32 %v1149_v33  ;;  %2166 = vmatpush3.msra.mxu0 %v1238_v34 }
 0x851   :  { %2176 = vmatprep.subr.mxu0 %v2346_v15 }
 0x853   :  { %v1364_v54 = vpop.permute.xlu0 %1363 }
 0x857   :  { %v1442_v56 = vpop.permute.xlu0 %1441 }
 0x85a   :  { %v2272_v35 = vpop.eup %2271 }
 0x85b   :  { %v1154_v36 = vsel %vm206_vm6, %v2272_v35, 0.0 }
 0x85c   :  { %1155 = vadd.xlane.f32.xlu1 %v1154_v36 }
 0x86d   :  { %1443 = vrot.lane.b32.xlu1 %v2490_v49, %s2355_s27 }
 0x881   :  { %v925_v37 = vpop.f32.mrb[8].mxu1 }
 0x882   :  { %v2615_v38 = vadd.f32 %v972_v21, %v925_v37  ;;  %v2142_v39 = vpop.f32.mrb[9].mxu1 }
 0x883   :  { %v928_v40 = vpop.f32.mrb[10].mxu1  ;;  %v202_v39 = vld [vmem:[%s2754_s6 + $0xc] sm:$0xf] }
 0x884   :  { %v2617_v41 = vadd.f32 %v975_v23, %v928_v40  ;;  %v2143_v42 = vpop.f32.mrb[11].mxu1  ;;  %v1702_v40 = vsel %vm887_vm9, %v202_v39, 0 }
 0x889   :  { %v1053_v43 = vpop.f32.mrb[12].mxu1 }
 0x88a   :  { %v1135_v44 = vmul.f32 0.35355338, %v1053_v43  ;;  %v2154_v45 = vpop.f32.mrb[13].mxu1 }
 0x88c   :  { %v1137_v47 = vadd.f32 %v1135_v44, %v2514_v60 }
 0x88e   :  { %v1139_v48 = vsel %vm206_vm6, %v1137_v47, -inf }
 0x891   :  { %1140 = vmax.xlane.f32.xlu1 %v1139_v48 }
 0x8e9   :  { %v1156_v51 = vpop.xlane.xlu1 %1155 }
 0x8ea   :  { %2273 = vrcp.f32 %v1156_v51 }
 0x8ed   :  { %v1444_v55 = vpop.permute.xlu1 %1443 }
 0x8f4   :  { %v2274_v52 = vpop.eup %2273 }
 0x8f5   :  { %v1160_v53 = vmul.f32 %v2274_v52, %v2272_v35 }
 0x8f7   :  { %2168 = vmatmul.mubr.msk.f32.vlgmr.msra.gmra.mrb[18].mxu0 %vm206_vm6, %v1160_v53 }
 0x8f8   :  { %2177 = vmatpush3.xpose.msk.msra.mxu0 %vm206_vm6, %v1366_v50  ;;  %2178 = vmatprep.mubr.msk.f32.mxu0 %vm2347_vm1, %v2346_v15 }
 0x8f9   :  { %2181 = vmatprep.subr.mxu0 %v2346_v15 }
 0x8fb   :  { %2179 = vmatmul.mubr.msk.f32.vlgmr.msra.gmra.mrb[20].mxu0 %vm206_vm6, %v1364_v54 }
 0x8fc   :  { %2182 = vmatpush3.xpose.msk.msra.mxu0 %vm206_vm6, %v1444_v55  ;;  %2183 = vmatprep.mubr.msk.f32.mxu0 %vm2347_vm1, %v2346_v15 }
 0x8fd   :  { %2191 = vmatprep.subr.mxu0 %v2346_v15 }
 0x8ff   :  { %2184 = vmatmul.mubr.msk.f32.vlgmr.msra.gmra.mrb[22].mxu0 %vm206_vm6, %v1442_v56 }
 0x900   :  { %2193 = vmatprep.mubr.msk.f32.mxu0 %vm2347_vm1, %v2346_v15 }
 0x91e   :  { %v1141_v57 = vpop.xlane.xlu1 %1140 }
 0x91f   :  { %v1145_v58 = vsub.f32 %v1137_v47, %v1141_v57 }
 0x921   :  { %v1147_v59 = vmul.f32 1.442695, %v1145_v58 }
 0x923   :  { %2275 = vpow2.f32 %v1147_v59 }
 0x92d   :  { %v2276_v61 = vpop.eup %2275 }
 0x92e   :  { %v1151_v62 = vsel %vm206_vm6, %v2276_v61, 0.0 }
 0x92f   :  { %1152 = vadd.xlane.f32.xlu0 %v1151_v62 }
 0x945   :  { %1161 = vrot.lane.b32.xlu0 %v2488_v46, %s2356_s15 }
 0x949   :  { %1621 = vrot.lane.b32.xlu0 %v2490_v49, %s2358_s17 }
 0x9bc   :  { %v1153_v63 = vpop.xlane.xlu0 %1152 }
 0x9bd   :  { %2277 = vrcp.f32 %v1153_v63 }
 0x9c0   :  { %v1162_v3 = vpop.permute.xlu0 %1161 }
 0x9c1   :  { %2161 = vmatpush3.msra.mxu1 %v1162_v3 }
 0x9c2   :  { %2170 = vmatprep.subr.bf16.mxu1 %v2346_v15 }
 0x9c4   :  { %v1622_v4 = vpop.permute.xlu0 %1621 }
 0x9c5   :  { %2192 = vmatpush3.msra.mxu0 %v1622_v4 }
 0x9c6   :  { %2202 = vmatprep.subr.bf16.mxu0 %v2346_v15 }
 0x9c7   :  { %v2278_v5 = vpop.eup %2277 }
 0x9c8   :  { %v1159_v6 = vmul.f32 %v2278_v5, %v2276_v61 }
 0x9ca   :  { %2163 = vmatmul.mubr.msk.f32.vlgmr.msra.gmra.mrb[14].mxu1 %vm206_vm6, %v1159_v6  ;;  %v1309_v7 = vpop.f32.mrb[18].mxu0 }
 0x9cb   :  { %v2169_v8 = vpop.f32.mrb[19].mxu0  ;;  %2172 = vmatprep.mubr.msk.bf16.mxu1 %vm2347_vm1, %v2346_v15  ;;  %2171 = vmatpush3.bf16.msra.mxu1 %v1318_v20 }
 0x9cc   :  { %2186 = vmatprep.subr.mxu1 %v2346_v15 }
 0x9ce   :  { %v1437_v49 = vpop.f32.mrb[20].mxu0 }
 0x9cf   :  { %v1519_v9 = vmul.f32 0.35355338, %v1437_v49  ;;  %v2180_v10 = vpop.f32.mrb[21].mxu0 }
 0x9d1   :  { %v1521_v11 = vadd.f32 %v1519_v9, %v2514_v60 }
 0x9d2   :  { %v1515_v12 = vpop.f32.mrb[22].mxu0 }
 0x9d3   :  { %v1520_v13 = vmul.f32 0.35355338, %v1515_v12  ;;  %v2185_v14 = vpop.f32.mrb[23].mxu0  ;;  %v1523_v16 = vsel %vm206_vm6, %v1521_v11, -inf }
 0x9d4   :  { %1524 = vmax.xlane.f32.xlu1 %v1523_v16  ;;  %v2242_v14 = vld [vmem:[%s2758_s10 + $0x8] sm:$0xff]   ;;  %v2243_v16 = vld [vmem:[%s2760_s12] sm:$0xff]  }
 0x9d5   :  { %v1522_v17 = vadd.f32 %v1520_v13, %v2516_v2  ;;  %v2241_v13 = vld [vmem:[%s2758_s10] sm:$0xff]  }
 0x9d7   :  { %v1526_v18 = vsel %vm206_vm6, %v1522_v17, -inf }
 0x9d8   :  { %1527 = vmax.xlane.f32.xlu1 %v1526_v18 }
 0xa61   :  { %v1525_v60 = vpop.xlane.xlu1 %1524 }
 0xa62   :  { %v1529_v21 = vsub.f32 %v1521_v11, %v1525_v60 }
 0xa64   :  { %v1531_v22 = vmul.f32 1.442695, %v1529_v21 }
 0xa65   :  { %v1528_v23 = vpop.xlane.xlu1 %1527 }
 0xa66   :  { %2279 = vpow2.f32 %v1531_v22  ;;  %v1530_v24 = vsub.f32 %v1522_v17, %v1528_v23  ;;  %v2244_v17 = vld [vmem:[%s2760_s12 + $0x8] sm:$0xff]  }
 0xa68   :  { %v1533_v25 = vmul.f32 1.442695, %v1530_v24 }
 0xa6a   :  { %2281 = vpow2.f32 %v1533_v25 }
 0xa70   :  { %v2280_v2 = vpop.eup %2279 }
 0xa71   :  { %v1535_v26 = vsel %vm206_vm6, %v2280_v2, 0.0 }
 0xa72   :  { %1536 = vadd.xlane.f32.xlu1 %v1535_v26 }
 0xa74   :  { %v2282_v27 = vpop.eup %2281 }
 0xa75   :  { %v1538_v28 = vsel %vm206_vm6, %v2282_v27, 0.0 }
 0xa76   :  { %1539 = vadd.xlane.f32.xlu1 %v1538_v28 }
 0xa87   :  { %1545 = vrot.lane.b32.xlu1 %v2488_v46, %s2358_s17 }
 0xa9d   :  { %v1233_v29 = vpop.f32.mrb[14].mxu1 }
 0xa9e   :  { %v1313_v30 = vpack.c.bf16 %v1309_v7, %v1233_v29  ;;  %v2164_v31 = vpop.f32.mrb[15].mxu1 }
 0xaa0   :  { %2173 = vmatmul.mubr.msk.bf16.vlgmr.msra.gmra.mrb[16].mxu1 %vm206_vm6, %v1313_v30 }
 0xaa1   :  { %2188 = vmatprep.mubr.msk.f32.mxu1 %vm2347_vm1, %v2346_v15 }
 0xaff   :  { %v1537_v32 = vpop.xlane.xlu1 %1536 }
 0xb00   :  { %2283 = vrcp.f32 %v1537_v32  ;;  %v2027_v32 = vld [vmem:[%s2756_s8] ss:$0 sm:$0xff] }
 0xb03   :  { %v1540_v33 = vpop.xlane.xlu1 %1539 }
 0xb04   :  { %2285 = vrcp.f32 %v1540_v33 }
 0xb07   :  { %v1546_v34 = vpop.permute.xlu1 %1545 }
 0xb08   :  { %2187 = vmatpush3.msra.mxu1 %v1546_v34 }
 0xb09   :  { %2196 = vmatprep.subr.bf16.mxu1 %v2346_v15 }
 0xb0a   :  { %v2284_v35 = vpop.eup %2283 }
 0xb0b   :  { %v1543_v36 = vmul.f32 %v2284_v35, %v2280_v2 }
 0xb0d   :  { %2189 = vmatmul.mubr.msk.f32.vlgmr.msra.gmra.mrb[20].mxu1 %vm206_vm6, %v1543_v36 }
 0xb0e   :  { %v2286_v46 = vpop.eup %2285  ;;  %2198 = vmatprep.mubr.msk.bf16.mxu1 %vm2347_vm1, %v2346_v15  ;;  %2197 = vmatpush3.bf16.msra.mxu1 %v1702_v40 }
 0xb0f   :  { %v1544_v37 = vmul.f32 %v2286_v46, %v2282_v27  ;;  %2210 = vmatprep.subr.bf16.mxu1 %v2346_v15 }
 0xb11   :  { %2194 = vmatmul.mubr.msk.f32.vlgmr.msra.gmra.mrb[24].mxu0 %vm206_vm6, %v1544_v37  ;;  %v2028_v37 = vld [vmem:[%s2757_s9] ss:$0 sm:$0xff] }
 0xb12   :  { %2206 = vmatprep.mubr.msk.bf16.mxu0 %vm2347_vm1, %v2346_v15  ;;  %2203 = vmatpush3.bf16.msra.mxu0 %v2241_v13 }
 0xb13   :  { %2204 = vmatprep.subr.bf16.mxu0 %v2346_v15 }
 0xb16   :  { %2205 = vmatpush3.bf16.msra.mxu0 %v2242_v14 }
 0xb73   :  { %v1354_v42 = vpop.f32.mrb[16].mxu1 }
 0xb74   :  { %v1361_v43 = vadd.f32 %v1354_v42, %v2615_v38  ;;  %v2174_v44 = vpop.f32.mrb[17].mxu1  ;;  %v2026_v38 = vld [vmem:[%s2755_s7] ss:$0 sm:$0xff] }
 0xb75   :  { %v1357_v45 = vpop.f32.mrb[18].mxu1  ;;  %v2245_v44 = vld [vmem:[%s2760_s12 + $0x10] sm:$0xff]  }
 0xb76   :  { %v1362_v47 = vadd.f32 %v1357_v45, %v2617_v41  ;;  %v2175_v48 = vpop.f32.mrb[19].mxu1  ;;  %v2246_v45 = vld [vmem:[%s2760_s12 + $0x18] sm:$0xff]  }
 0xbe0   :  { %v1617_v50 = vpop.f32.mrb[20].mxu1 }
 0xbe1   :  { %v2190_v51 = vpop.f32.mrb[21].mxu1 }
 0xbe4   :  { %v1693_v52 = vpop.f32.mrb[24].mxu0 }
 0xbe5   :  { %v1697_v53 = vpack.c.bf16 %v1693_v52, %v1617_v50  ;;  %v2195_v54 = vpop.f32.mrb[25].mxu0 }
 0xbe7   :  { %2199 = vmatmul.mubr.msk.bf16.vlgmr.msra.gmra.mrb[24].mxu1 %vm206_vm6, %v1697_v53 }
 0xbe8   :  { %2218 = vmatprep.mubr.msk.bf16.mxu1 %vm2347_vm1, %v2346_v15  ;;  %2211 = vmatpush3.bf16.msra.mxu1 %v2243_v16 }
 0xbe9   :  { %2212 = vmatprep.subr.bf16.mxu1 %v2346_v15 }
 0xbec   :  { %2213 = vmatpush3.bf16.msra.mxu1 %v2244_v17 }
 0xbed   :  { %2214 = vmatprep.subr.bf16.mxu1 %v2346_v15 }
 0xbf0   :  { %2215 = vmatpush3.bf16.msra.mxu1 %v2245_v44 }
 0xbf1   :  { %2216 = vmatprep.subr.bf16.mxu1 %v2346_v15  ;;  %v2033_v15 = vld [vmem:[%s2761_s13] ss:$0 sm:$0xff] }
 0xbf4   :  { %2217 = vmatpush3.bf16.msra.mxu1 %v2246_v45 }
 0xcba   :  { %v1738_v55 = vpop.f32.mrb[24].mxu1 }
 0xcbb   :  { %v1745_v56 = vadd.f32 %v1738_v55, %v1361_v43  ;;  %v2200_v57 = vpop.f32.mrb[25].mxu1 }
 0xcbc   :  { %v1741_v58 = vpop.f32.mrb[26].mxu1 }
 0xcbd   :  { %v1754_v41 = vadd.f32 %v2026_v38, %v1745_v56  ;;  %v1746_v59 = vadd.f32 %v1741_v58, %v1362_v47  ;;  %v2201_v61 = vpop.f32.mrb[27].mxu1  ;;  %v2029_v47 = vld [vmem:[%s2759_s11] ss:$0 sm:$0xff]  ;;  %s2359_s11 = smov [#allocation5]  }
 0xcbe   :  { %s1980_s12 = sshll.u32 %s2359_s11, 4  ;;  %s1981_s12 = int_to_ptr.vmem [resolvable:$true] %s1980_s12 }
 0xcbf   :  { %v2681_v62 = vadd.f32 %v1754_v41, %v2450_v0  ;;  %v1755_v63 = vadd.f32 %v2026_v38, %v1746_v59  ;;  %s2317_s3 = scalar_lea.vmem %s1981_s12, 256  ;;  %p2322_p9 = scmp.lt.s32.totalorder %s1981_s12, %s1981_s12 }
 0xcc0   :  { %p2318_p8 = scmp.ne.s32.totalorder %s1981_s12, %s2317_s3  ;;  %p2323_p10 = scmp.lt.s32.totalorder %s2317_s3, %s2317_s3 }
 0xcc1   :  { %v2684_v3 = vadd.f32 %v1755_v63, %v2452_v1  ;;  %v1760_v4 = vsel %vm67_vm0, %v2681_v62, 0.0 }
 0xcc2   :  { %1761 = vadd.xlane.f32.xlu0 %v1760_v4  ;;  %p2324_p11 = por %p2323_p10, %p2322_p9 }
 0xcc3   :  { %v1763_v5 = vsel %vm67_vm0, %v2684_v3, 0.0 }
 0xcc4   :  { %1764 = vadd.xlane.f32.xlu1 %v1763_v5  ;;  %p2325_p12 = pnand %p2324_p11, %p2318_p8 }
 0xd4f   :  { %v1762_v6 = vpop.xlane.xlu0 %1761 }
 0xd50   :  { %v1766_v7 = vmul.f32 0.03125, %v1762_v6 }
 0xd51   :  { %v1765_v8 = vpop.xlane.xlu1 %1764 }
 0xd52   :  { %v1768_v49 = vsub.f32 %v2681_v62, %v1766_v7  ;;  %v1767_v9 = vmul.f32 0.03125, %v1765_v8 }
 0xd54   :  { %v1769_v0 = vsub.f32 %v2684_v3, %v1767_v9  ;;  %v1770_v10 = vmul.f32 %v1768_v49, %v1768_v49  ;;  %v1804_v34 = vmul.f32 %v2027_v32, %v1768_v49 }
 0xd56   :  { %v1772_v1 = vsel %vm67_vm0, %v1770_v10, 0.0  ;;  %v1771_v11 = vmul.f32 %v1769_v0, %v1769_v0  ;;  %v1805_v35 = vmul.f32 %v2027_v32, %v1769_v0 }
 0xd57   :  { %1773 = vadd.xlane.f32.xlu0 %v1772_v1 }
 0xd58   :  { %v1775_v12 = vsel %vm67_vm0, %v1771_v11, 0.0 }
 0xd5b   :  { %1776 = vadd.xlane.f32.xlu0 %v1775_v12 }
 0xde4   :  { %v1774_v18 = vpop.xlane.xlu0 %1773 }
 0xde5   :  { %v1778_v19 = vmul.f32 0.032258064, %v1774_v18 }
 0xde7   :  { %2287 = vrsqrt.f32 %v1778_v19  ;;  %vm1782_vm10 = vcmp.eq.f32.partialorder %v1778_v19, inf  ;;  %v1785_v23 = vand.u32 2147483648, %v1778_v19  ;;  %vm1784_vm11 = vcmp.eq.f32.partialorder %v1778_v19, 0.0 }
 0xde8   :  { %v1777_v20 = vpop.xlane.xlu0 %1776 }
 0xde9   :  { %v1779_v60 = vmul.f32 0.032258064, %v1777_v20 }
 0xdeb   :  { %2289 = vrsqrt.f32 %v1779_v60  ;;  %vm1789_vm12 = vcmp.eq.f32.partialorder %v1779_v60, inf  ;;  %v1792_v28 = vand.u32 2147483648, %v1779_v60  ;;  %vm1791_vm13 = vcmp.eq.f32.partialorder %v1779_v60, 0.0 }
 0xdf1   :  { %v2288_v21 = vpop.eup %2287 }
 0xdf2   :  { %v1781_v22 = vmul.f32 %v2288_v21, %v1778_v19 }
 0xdf4   :  { %v1783_v24 = vsel %vm1782_vm10, %v1778_v19, %v1781_v22 }
 0xdf5   :  { %v2290_v25 = vpop.eup %2289  ;;  %v1786_v2 = vsel %vm1784_vm11, %v1785_v23, %v1783_v24 }
 0xdf6   :  { %v1794_v26 = vadd.f32 1e-06, %v1786_v2  ;;  %v1788_v27 = vmul.f32 %v2290_v25, %v1779_v60 }
 0xdf8   :  { %2291 = vrcp.f32 %v1794_v26  ;;  %v1790_v29 = vsel %vm1789_vm12, %v1779_v60, %v1788_v27 }
 0xdf9   :  { %v1793_v30 = vsel %vm1791_vm13, %v1792_v28, %v1790_v29 }
 0xdfa   :  { %v1795_v31 = vadd.f32 1e-06, %v1793_v30 }
 0xdfc   :  { %2293 = vrcp.f32 %v1795_v31 }
 0xe02   :  { %v2292_v33 = vpop.eup %2291 }
 0xe03   :  { %v1806_v36 = vmul.f32 %v2292_v33, %v1804_v34 }
 0xe05   :  { %v1814_v40 = vadd.f32 %v2028_v37, %v1806_v36 }
 0xe06   :  { %v2294_v46 = vpop.eup %2293 }
 0xe07   :  { %v1807_v39 = vmul.f32 %v2294_v46, %v1805_v35 }
 0xe09   :  { %v1815_v42 = vadd.f32 %v2028_v37, %v1807_v39 }
 0xe0b   :  { %v1816_v43 = vpack.c.bf16 %v1815_v42, %v1814_v40 }
 0xe0d   :  { %2207 = vmatmul.mubr.msk.bf16.vlgmr.msra.gmra.mrb[28].mxu0 %vm67_vm0, %v1816_v43 }
 0xee0   :  { %v1877_v48 = vpop.f32.mrb[28].mxu0 }
 0xee1   :  { %v1878_v50 = vadd.f32 %v2029_v47, %v1877_v48  ;;  %v2208_v51 = vpop.f32.mrb[29].mxu0 }
 0xee2   :  { %v1880_v52 = vpop.f32.mrb[30].mxu0 }
 0xee3   :  { %v1881_v53 = vadd.f32 %v2029_v47, %v1880_v52  ;;  %v2209_v54 = vpop.f32.mrb[31].mxu0  ;;  %v1884_v55 = vmax.f32 %v1878_v50, 0.0 }
 0xee5   :  { %v1885_v38 = vmax.f32 %v1881_v53, 0.0 }
 0xee7   :  { %v1886_v56 = vpack.c.bf16 %v1885_v38, %v1884_v55 }
 0xee9   :  { %2219 = vmatmul.mubr.msk.bf16.vlgmr.msra.gmra.mrb[28].mxu1 %vm1926_vm14, %v1886_v56 }
 0xfbc   :  { %v1964_v57 = vpop.f32.mrb[28].mxu1 }
 0xfbd   :  { %v1965_v58 = vadd.f32 %v2033_v15, %v1964_v57  ;;  %v2220_v41 = vpop.f32.mrb[29].mxu1 }
 0xfbe   :  { %v1967_v59 = vpop.f32.mrb[30].mxu1 }
 0xfbf   :  { %v1971_v61 = vadd.f32 %v1965_v58, %v2681_v62  ;;  %v1968_v63 = vadd.f32 %v2033_v15, %v1967_v59  ;;  %v2221_v4 = vpop.f32.mrb[31].mxu1 }
 0xfc1   :  { %1973 = vst.msk [vmem:[#allocation5] sm:$0xff] %vm67_vm0, %v1971_v61  ;;  %v1972_v5 = vadd.f32 %v1968_v63, %v2684_v3 }
 0xfc3   :  { %1974 = vst.msk [vmem:[#allocation5 + $0x8] sm:$0xff] %vm67_vm0, %v1972_v5 }
 0xfc4   :  { %2328 = shalt.err (!%p2325_p12)
}
 0xfc5   :  { %s2329_s18 = scalar_lea.hbm %s2762_s14, 256 }
 0xfc6   :  { %p2330_p13 = scmp.ne.s32.totalorder %s2762_s14, %s2329_s18  ;;  %p2333_p0 = scmp.lt.u32.totalorder %s2329_s18, %s2762_s14 }
 0xfc8   :  { %p2335_p1 = pnand %p2333_p0, %p2330_p13 }
 0xfca   :  { %2338 = shalt.err (!%p2335_p1)
}
 0xfcb   :  { %1986 = dma.vmem_to_hbm [thread:$0]  %s1981_s12, 256, %s2762_s14, [#allocation4], %s2344_s23, %s2344_s23, %s2345_s24  }
 0xfcc   :  { %2341 = dma.done.wait [#allocation4], 256  }
 0xfcd   :  { %2342 = vsyncadd [#allocation4], 4294967040 }
 0xfce   :  { %1990 = vsyncpa [#allocation3], 1 }
 0xfcf   :  { %1991 = vsyncpa [#allocation4], 1 }

</bundles_post_ra>
